<compile_context>
chip_gen: v6e
topology: v6e:2x2x1
jax: 0.10.0
libtpu: 0.0.40
codegen_flags: <defaults>
</compile_context>

<pallas_src>
import jax
import jax.numpy as jnp
from jax.experimental import pallas as pl
from jax.experimental.pallas import tpu as pltpu

_EPS = 1e-12          # F.normalize default eps: x / max(||x||_2, eps)
_TILE_N_CAP = 512     # input-row tile
_TILE_M_CAP = 512     # embed-row tile


def _num_tensorcores_per_chip():
    """Best-effort: 2 for megacore-style chips (v7x/v4/v5p), else 1."""
    try:
        kind = jax.devices()[0].device_kind.lower()
    except Exception:
        return 1
    return 2 if any(t in kind for t in ("v7", "7x", "v4", "v5p")) else 1


def _make_prompt_kernel(n_total, m_total, tile_n, tile_m, mask_n, mask_m):
    """Builds the fused distance + arcsin + partial-sum kernel (static shapes)."""

    def kernel(x_ref, en_ref, out_ref):
        # x_ref : (tile_n, D) raw input rows (un-normalized, original dtype)
        # en_ref: (tile_m, D) unit-norm embed rows, bf16 (pre-normalized)
        # out_ref: (1, 1, tile_n, 1) partial sums of 2*arcsin(d/2)^2 over tile_m
        x = x_ref[...]
        xf = x.astype(jnp.float32)

        # Row norms in f32; the scale is folded in AFTER the f32 accumulator.
        sq = jnp.sum(xf * xf, axis=-1, keepdims=True)            # (tile_n, 1)
        inv = jax.lax.rsqrt(jnp.maximum(sq, _EPS * _EPS))        # (tile_n, 1)

        # MXU: g_raw[n, m] = <x_n, e_m>; bf16 operands, f32 accumulation.
        g_raw = jax.lax.dot_general(
            x.astype(jnp.bfloat16), en_ref[...],
            dimension_numbers=(((1,), (1,)), ((), ())),
            preferred_element_type=jnp.float32)                  # (tile_n, tile_m)

        # Cosine between unit vectors; clip AFTER the 1/||x|| scale so fp
        # cancellation cannot push the sqrt argument negative.
        g = g_raw * inv                                          # lane broadcast
        d = jnp.sqrt(jnp.clip(2.0 - 2.0 * g, 0.0, 4.0))          # chord distance
        h = 0.5 * d                                              # in [0, 1]

        # arcsin(h) via Abramowitz-Stegun 4.4.45 (|err| <= 7e-5 on [0, 1]);
        # pure VPU + sqrt, no transcendental lowering required.
        poly = 1.5707288 + h * (-0.2121144 + h * (0.0742610 + h * (-0.0187293)))
        asin = 1.5707963267948966 - jnp.sqrt(jnp.maximum(1.0 - h, 0.0)) * poly
        dist = 2.0 * asin * asin                                 # (tile_n, tile_m)

        # Zero out zero-padded rows/cols (masks vanish when shapes align).
        valid = None
        if mask_n:
            rows = (jax.lax.broadcasted_iota(jnp.int32, (tile_n, tile_m), 0)
                    + pl.program_id(1) * tile_n)
            valid = rows < n_total
        if mask_m:
            cols = (jax.lax.broadcasted_iota(jnp.int32, (tile_n, tile_m), 1)
                    + pl.program_id(0) * tile_m)
            vm = cols < m_total
            valid = vm if valid is None else (valid & vm)
        if valid is not None:
            dist = jnp.where(valid, dist, 0.0)

        out_ref[...] = jnp.sum(dist, axis=1, keepdims=True).reshape(
            1, 1, tile_n, 1)

    return kernel


def prompt_forward(inp, embed, weight, stop):
    """Pallas port of Prompt.forward -> scalar loss (forward value only)."""
    n, d = inp.shape
    m, d2 = embed.shape
    assert d == d2

    # One-shot embed L2 normalization in plain JAX (tiny), emitted as bf16 so
    # the kernel never re-casts the constant block and its DMA bytes halve.
    ef = embed.astype(jnp.float32)
    ef = ef * jax.lax.rsqrt(
        jnp.maximum(jnp.sum(ef * ef, axis=-1, keepdims=True), _EPS * _EPS))
    en = ef.astype(jnp.bfloat16)

    # ---- tile sizes --------------------------------------------------------
    if m <= _TILE_M_CAP:
        tile_m, m_pad = m, m                 # block == full dim: always legal
    else:
        tile_m = _TILE_M_CAP                 # multiple of 8
        m_pad = pl.cdiv(m, tile_m) * tile_m
        en = jnp.pad(en, ((0, m_pad - m), (0, 0)))

    tile_n = max(128, min(_TILE_N_CAP, 128 * pl.cdiv(n, 128)))
    # Only 2-TensorCore chips benefit from shrinking the tile to create >= 2
    # parallel grid cells; on single-TC v5e/v6e it is pure grid overhead.
    if _num_tensorcores_per_chip() >= 2:
        while tile_n > 128 and (m_pad // tile_m) * pl.cdiv(n, tile_n) < 2:
            tile_n -= 128
    n_pad = pl.cdiv(n, tile_n) * tile_n
    if n_pad != n:
        inp = jnp.pad(inp, ((0, n_pad - n), (0, 0)))

    nm, nn = m_pad // tile_m, n_pad // tile_n
    kernel = _make_prompt_kernel(n, m, tile_n, tile_m,
                                 mask_n=(n_pad != n), mask_m=(m_pad != m))

    # Per-tile partial sums; the (M, N) distance matrix never touches HBM.
    partials = pl.pallas_call(
        kernel,
        out_shape=jax.ShapeDtypeStruct((nm, nn, tile_n, 1), jnp.float32),
        grid_spec=pltpu.PrefetchScalarGridSpec(
            num_scalar_prefetch=0,
            grid=(nm, nn),
            in_specs=[
                pl.BlockSpec((tile_n, d), lambda im, i: (i, 0)),   # input rows
                # Constant across the inner axis -> fetched once per outer step.
                pl.BlockSpec((tile_m, d), lambda im, i: (im, 0)),  # bf16 embed
            ],
            out_specs=pl.BlockSpec((1, 1, tile_n, 1),
                                   lambda im, i: (im, i, 0, 0)),
        ),
        compiler_params=pltpu.CompilerParams(
            dimension_semantics=("parallel", "parallel")),
    )(inp, en)

    mean = jnp.sum(partials) / jnp.float32(n * m)
    w = jnp.asarray(weight, jnp.float32)
    # ReplaceGrad.forward returns its first argument unchanged; `stop` only
    # shapes the backward pass, so the forward value ignores it.
    del stop
    return jnp.abs(w) * (jnp.sign(w) * mean)


def _reference_forward(inp, embed, weight, stop):
    """Pure-JAX reference mirroring the PyTorch ops exactly (f32 end-to-end)."""
    xn = inp[:, None, :] / jnp.maximum(
        jnp.linalg.norm(inp[:, None, :], axis=2, keepdims=True), _EPS)
    en = embed[None, :, :] / jnp.maximum(
        jnp.linalg.norm(embed[None, :, :], axis=2, keepdims=True), _EPS)
    dists = 2.0 * jnp.arcsin(jnp.linalg.norm(xn - en, axis=2) / 2.0) ** 2
    dists = dists * jnp.sign(weight)
    del stop
    return jnp.abs(weight) * jnp.mean(dists)


if __name__ == "__main__":
    key = jax.random.PRNGKey(0)
    k_in, k_emb = jax.random.split(key)

    # N cutout embeddings, M prompt embeddings, embedding dim D.
    # N=200 is deliberately ragged to exercise the padding + in-kernel mask.
    N, M, D = 200, 2, 128
    inp = jax.random.normal(k_in, (N, D), dtype=jnp.float32)
    # Deterministic buffers from Prompt.__init__(embed, weight=1.0, stop=-inf):
    embed = jax.random.normal(k_emb, (M, D), dtype=jnp.float32)   # buffer 'embed'
    weight = jnp.asarray(1.0, dtype=jnp.float32)                  # buffer 'weight'
    stop = jnp.asarray(-jnp.inf, dtype=jnp.float32)               # buffer 'stop'

    out = jax.jit(prompt_forward)(inp, embed, weight, stop)
    out = jax.block_until_ready(out)

    ref = _reference_forward(inp, embed, weight, stop)
    # bf16 MXU operands (f32 accumulation) + the arcsin polynomial give ~1e-3
    # relative error on an O(1) loss; well inside this tolerance.
    assert out.shape == () and jnp.allclose(out, ref, rtol=1e-2, atol=1e-2), (out, ref)
    print("KERNEL_OK")
</pallas_src>

<mosaic_0001>
module attributes {stable_mosaic.version = 11 : i64} {
  func.func @kernel(%arg0: i32, %arg1: i32, %arg2: memref<256x128xf32, #tpu.memory_space<vmem>>, %arg3: memref<2x128xbf16, #tpu.memory_space<vmem>>, %arg4: memref<1x1x256x1xf32, #tpu.memory_space<vmem>>) attributes {dimension_semantics = [#tpu.dimension_semantics<parallel>, #tpu.dimension_semantics<parallel>], iteration_bounds = array<i64: 1, 1>, scalar_prefetch = 0 : i64, scratch_operands = 0 : i64, tpu.core_type = #tpu.core_type<tc>, window_params = [{transform_indices = @transform_0, window_bounds = array<i64: 256, 128>}, {transform_indices = @transform_1, window_bounds = array<i64: 2, 128>}, {transform_indices = @transform_2, window_bounds = array<i64: 1, 1, 256, 1>}]} {
    %c0 = arith.constant 0 : index
    %c0_0 = arith.constant 0 : index
    %0 = vector.load %arg2[%c0, %c0_0] : memref<256x128xf32, #tpu.memory_space<vmem>>, vector<256x128xf32>
    %1 = arith.mulf %0, %0 : vector<256x128xf32>
    %cst = arith.constant dense<0.000000e+00> : vector<256xf32>
    %2 = vector.multi_reduction <add>, %1, %cst [1] : vector<256x128xf32> to vector<256xf32>
    %3 = vector.shape_cast %2 : vector<256xf32> to vector<256x1xf32>
    %cst_1 = arith.constant 1.000000e-24 : f32
    %4 = vector.broadcast %cst_1 : f32 to vector<256x1xf32>
    %5 = arith.maximumf %3, %4 : vector<256x1xf32>
    %6 = math.rsqrt %5 : vector<256x1xf32>
    %7 = arith.truncf %0 : vector<256x128xf32> to vector<256x128xbf16>
    %c0_2 = arith.constant 0 : index
    %c0_3 = arith.constant 0 : index
    %8 = vector.load %arg3[%c0_2, %c0_3] : memref<2x128xbf16, #tpu.memory_space<vmem>>, vector<2x128xbf16>
    %cst_4 = arith.constant dense<0.000000e+00> : vector<256x2xf32>
    %9 = tpu.matmul %7, %8, %cst_4 {dimension_numbers = #tpu.dot_dimension_numbers<[1], [1], [0], [0], [0, 0, 1, 0], [], []>} : vector<256x128xbf16>, vector<2x128xbf16>, vector<256x2xf32> -> vector<256x2xf32>
    %10 = vector.broadcast %6 : vector<256x1xf32> to vector<256x2xf32>
    %11 = arith.mulf %9, %10 : vector<256x2xf32>
    %cst_5 = arith.constant 2.000000e+00 : f32
    %12 = vector.broadcast %cst_5 : f32 to vector<256x2xf32>
    %13 = arith.mulf %12, %11 : vector<256x2xf32>
    %cst_6 = arith.constant 2.000000e+00 : f32
    %14 = vector.broadcast %cst_6 : f32 to vector<256x2xf32>
    %15 = arith.subf %14, %13 : vector<256x2xf32>
    %cst_7 = arith.constant 0.000000e+00 : f32
    %cst_8 = arith.constant 4.000000e+00 : f32
    %16 = vector.broadcast %cst_7 : f32 to vector<256x2xf32>
    %17 = arith.maximumf %16, %15 : vector<256x2xf32>
    %18 = vector.broadcast %cst_8 : f32 to vector<256x2xf32>
    %19 = arith.minimumf %18, %17 : vector<256x2xf32>
    %20 = math.sqrt %19 : vector<256x2xf32>
    %cst_9 = arith.constant 5.000000e-01 : f32
    %21 = vector.broadcast %cst_9 : f32 to vector<256x2xf32>
    %22 = arith.mulf %21, %20 : vector<256x2xf32>
    %cst_10 = arith.constant -1.872930e-02 : f32
    %23 = vector.broadcast %cst_10 : f32 to vector<256x2xf32>
    %24 = arith.mulf %22, %23 : vector<256x2xf32>
    %cst_11 = arith.constant 7.426100e-02 : f32
    %25 = vector.broadcast %cst_11 : f32 to vector<256x2xf32>
    %26 = arith.addf %25, %24 : vector<256x2xf32>
    %27 = arith.mulf %22, %26 : vector<256x2xf32>
    %cst_12 = arith.constant -0.212114394 : f32
    %28 = vector.broadcast %cst_12 : f32 to vector<256x2xf32>
    %29 = arith.addf %28, %27 : vector<256x2xf32>
    %30 = arith.mulf %22, %29 : vector<256x2xf32>
    %cst_13 = arith.constant 1.57072878 : f32
    %31 = vector.broadcast %cst_13 : f32 to vector<256x2xf32>
    %32 = arith.addf %31, %30 : vector<256x2xf32>
    %cst_14 = arith.constant 1.000000e+00 : f32
    %33 = vector.broadcast %cst_14 : f32 to vector<256x2xf32>
    %34 = arith.subf %33, %22 : vector<256x2xf32>
    %cst_15 = arith.constant 0.000000e+00 : f32
    %35 = vector.broadcast %cst_15 : f32 to vector<256x2xf32>
    %36 = arith.maximumf %34, %35 : vector<256x2xf32>
    %37 = math.sqrt %36 : vector<256x2xf32>
    %38 = arith.mulf %37, %32 : vector<256x2xf32>
    %cst_16 = arith.constant 1.57079637 : f32
    %39 = vector.broadcast %cst_16 : f32 to vector<256x2xf32>
    %40 = arith.subf %39, %38 : vector<256x2xf32>
    %cst_17 = arith.constant 2.000000e+00 : f32
    %41 = vector.broadcast %cst_17 : f32 to vector<256x2xf32>
    %42 = arith.mulf %41, %40 : vector<256x2xf32>
    %43 = arith.mulf %42, %40 : vector<256x2xf32>
    %44 = tpu.iota {dimensions = array<i32: 0>} : vector<256x2xi32>
    %c256_i32 = arith.constant 256 : i32
    %45 = arith.muli %arg1, %c256_i32 : i32
    %46 = vector.broadcast %45 : i32 to vector<256x2xi32>
    %47 = arith.addi %44, %46 : vector<256x2xi32>
    %c200_i32 = arith.constant 200 : i32
    %48 = vector.broadcast %c200_i32 : i32 to vector<256x2xi32>
    %49 = arith.cmpi slt, %47, %48 : vector<256x2xi32>
    %cst_18 = arith.constant 0.000000e+00 : f32
    %50 = vector.broadcast %cst_18 : f32 to vector<256x2xf32>
    %51 = arith.select %49, %43, %50 : vector<256x2xi1>, vector<256x2xf32>
    %cst_19 = arith.constant dense<0.000000e+00> : vector<256xf32>
    %52 = vector.multi_reduction <add>, %51, %cst_19 [1] : vector<256x2xf32> to vector<256xf32>
    %53 = vector.shape_cast %52 : vector<256xf32> to vector<256x1xf32>
    %54 = vector.shape_cast %53 : vector<256x1xf32> to vector<1x1x256x1xf32>
    %c0_20 = arith.constant 0 : index
    %c0_21 = arith.constant 0 : index
    %c0_22 = arith.constant 0 : index
    %c0_23 = arith.constant 0 : index
    %55 = vector.load %arg4[%c0_20, %c0_21, %c0_22, %c0_23] : memref<1x1x256x1xf32, #tpu.memory_space<vmem>>, vector<1x1x256x1xf32>
    tpu.vector_store %arg4[%c0_20, %c0_21, %c0_22, %c0_23], %54 {strides = array<i32>} : memref<1x1x256x1xf32, #tpu.memory_space<vmem>>, vector<1x1x256x1xf32>,
    return
  }
  func.func @transform_0(%arg0: i32, %arg1: i32) -> (i32, i32) {
    %c0_i32 = arith.constant 0 : i32
    %c0_i32_0 = arith.constant 0 : i32
    return %arg1, %c0_i32 : i32, i32
  }
  func.func @transform_1(%arg0: i32, %arg1: i32) -> (i32, i32) {
    %c0_i32 = arith.constant 0 : i32
    %c0_i32_0 = arith.constant 0 : i32
    return %arg0, %c0_i32 : i32, i32
  }
  func.func @transform_2(%arg0: i32, %arg1: i32) -> (i32, i32, i32, i32) {
    %c0_i32 = arith.constant 0 : i32
    %c0_i32_0 = arith.constant 0 : i32
    %c0_i32_1 = arith.constant 0 : i32
    return %arg0, %arg1, %c0_i32, %c0_i32_0 : i32, i32, i32, i32
  }
}

</mosaic_0001>

<bundles_post_ra>
// kernel: prompt_forward.1
= control target key start
LH: loop header
LB: loop body
LE: loop exit
PB: predicated region body
PF: predicated region fallthrough
CT: control target
= control target key end

     0   :  { %vm1537_vm15 = vcmask 15360   ;;  %s2913_s1 = inlined_call_operand.vmem [shape: bf16[2,128], index: 1, kind: input, shape index: {}]   ;;  %s2914_s0 = inlined_call_operand.vmem [shape: f32[256,128], index: 0, kind: input, shape index: {}]   ;;  %s2915_s2 = inlined_call_operand.vmem [shape: f32[1,1,256,1], index: 2, kind: output, shape index: {}]  }
   0x1   :  { %v220_v0 = vld [vmem:[%s2913_s1] sm:$0x1]  ;;  %v13_v2 = vld [vmem:[%s2914_s0 + $0x8] sm:$0xff]  ;;  %v14_v6 = vld [vmem:[%s2914_s0 + $0x10] sm:$0xff] }
   0x2   :  { %v12_v1 = vld [vmem:[%s2914_s0] sm:$0xff]  ;;  %1688 = vmatprep.subr.bf16.mxu0 %v220_v0  ;;  %1722 = vmatprep.subr.bf16.mxu1 %v220_v0  ;;  %v1908_v5 = vld [vmem:[%s2914_s0 + $0x88] sm:$0xff]  ;;  %v15_v9 = vld [vmem:[%s2914_s0 + $0x18] sm:$0xff]  ;;  %v46_v12 = vmul.f32 %v14_v6, %v14_v6  ;;  %v45_v16 = vmul.f32 %v13_v2, %v13_v2 }
   0x3   :  { %v204_v3 = vpack.c.bf16 %v13_v2, %v12_v1  ;;  %v1903_v4 = vld [vmem:[%s2914_s0 + $0x80] sm:$0xff]  ;;  %v44_v7 = vmul.f32 %v12_v1, %v12_v1  ;;  %1689 = vmatpush3.bf16.xpose.msra.mxu0 %v220_v0  ;;  %1723 = vmatpush3.bf16.xpose.msra.mxu1 %v220_v0  ;;  %v1921_v10 = vld [vmem:[%s2914_s0 + $0x90] sm:$0xff]  ;;  %v1926_v11 = vld [vmem:[%s2914_s0 + $0x98] sm:$0xff]  ;;  %v47_v18 = vmul.f32 %v15_v9, %v15_v9 }
   0x4   :  { %v212_v8 = vpack.c.bf16 %v1908_v5, %v1903_v4  ;;  %v1931_v13 = vld [vmem:[%s2914_s0 + $0xa0] sm:$0xff]  ;;  %v1936_v14 = vld [vmem:[%s2914_s0 + $0xa8] sm:$0xff]  ;;  %80 = vadd.xlane.f32.xlu1 %v46_v12  ;;  %v205_v19 = vpack.c.bf16 %v15_v9, %v14_v6  ;;  %v213_v20 = vpack.c.bf16 %v1926_v11, %v1921_v10  ;;  %v18_v25 = vld [vmem:[%s2914_s0 + $0x30] sm:$0xff]  ;;  %v60_v59 = vmul.f32 %v1903_v4, %v1903_v4 }
   0x5   :  { %1690 = vmatprep.mubr.bf16.mxu0 %v204_v3  ;;  %76 = vadd.xlane.f32.xlu0 %v44_v7  ;;  %v16_v15 = vld [vmem:[%s2914_s0 + $0x20] sm:$0xff]  ;;  %v17_v17 = vld [vmem:[%s2914_s0 + $0x28] sm:$0xff]  ;;  %v214_v21 = vpack.c.bf16 %v1936_v14, %v1931_v13  ;;  %v19_v26 = vld [vmem:[%s2914_s0 + $0x38] sm:$0xff]  ;;  %v50_v33 = vmul.f32 %v18_v25, %v18_v25  ;;  %v61_v60 = vmul.f32 %v1908_v5, %v1908_v5 }
   0x6   :  { %1706 = vmatprep.mubr.bf16.mxu1 %v212_v8  ;;  %v206_v22 = vpack.c.bf16 %v17_v17, %v16_v15  ;;  %v48_v23 = vmul.f32 %v16_v15, %v16_v15  ;;  %v49_v24 = vmul.f32 %v17_v17, %v17_v17  ;;  %v34_v27 = vld [vmem:[%s2914_s0 + $0xb0] sm:$0xff]  ;;  %v1960_v28 = vld [vmem:[%s2914_s0 + $0xb8] sm:$0xff]  ;;  %v1965_v29 = vld [vmem:[%s2914_s0 + $0xc0] sm:$0xff]  ;;  %v51_v34 = vmul.f32 %v19_v26, %v19_v26 }
   0x7   :  { %v37_v30 = vld [vmem:[%s2914_s0 + $0xc8] sm:$0xff]  ;;  %v20_v31 = vld [vmem:[%s2914_s0 + $0x40] sm:$0xff]  ;;  %v207_v35 = vpack.c.bf16 %v19_v26, %v18_v25  ;;  %v215_v36 = vpack.c.bf16 %v1960_v28, %v34_v27  ;;  %v22_v41 = vld [vmem:[%s2914_s0 + $0x50] sm:$0xff]  ;;  %v62_v61 = vmul.f32 %v1921_v10, %v1921_v10  ;;  %v63_v62 = vmul.f32 %v1926_v11, %v1926_v11 }
   0x8   :  { %82 = vadd.xlane.f32.xlu1 %v47_v18  ;;  %v21_v32 = vld [vmem:[%s2914_s0 + $0x48] sm:$0xff]  ;;  %v216_v37 = vpack.c.bf16 %v37_v30, %v1965_v29  ;;  %v52_v39 = vmul.f32 %v20_v31, %v20_v31  ;;  %v23_v42 = vld [vmem:[%s2914_s0 + $0x58] sm:$0xff]  ;;  %v38_v43 = vld [vmem:[%s2914_s0 + $0xd0] sm:$0xff]  ;;  %v54_v47 = vmul.f32 %v22_v41, %v22_v41  ;;  %v64_v63 = vmul.f32 %v1931_v13, %v1931_v13 }
   0x9   :  { %78 = vadd.xlane.f32.xlu0 %v45_v16  ;;  %v208_v38 = vpack.c.bf16 %v21_v32, %v20_v31  ;;  %v53_v40 = vmul.f32 %v21_v32, %v21_v32  ;;  %v39_v44 = vld [vmem:[%s2914_s0 + $0xd8] sm:$0xff]  ;;  %v24_v45 = vld [vmem:[%s2914_s0 + $0x60] sm:$0xff]  ;;  %v25_v46 = vld [vmem:[%s2914_s0 + $0x68] sm:$0xff]  ;;  %v55_v48 = vmul.f32 %v23_v42, %v23_v42  ;;  %v209_v49 = vpack.c.bf16 %v23_v42, %v22_v41 }
   0xa   :  { %1691 = vmatmul.mubr.bf16.vlgmr.msra.gmra.mxu0 %v205_v19  ;;  %1707 = vmatmul.mubr.bf16.vlgmr.msra.gmra.mxu1 %v213_v20  ;;  %v217_v50 = vpack.c.bf16 %v39_v44, %v38_v43  ;;  %v210_v51 = vpack.c.bf16 %v25_v46, %v24_v45  ;;  %v56_v52 = vmul.f32 %v24_v45, %v24_v45  ;;  %v26_v54 = vld [vmem:[%s2914_s0 + $0x70] sm:$0xff]  ;;  %v27_v55 = vld [vmem:[%s2914_s0 + $0x78] sm:$0xff]  ;;  %v40_v4 = vld [vmem:[%s2914_s0 + $0xe0] sm:$0xff]  ;;  %v2916_v10 = vmov 0.0  }
   0xb   :  { %1710 = vmatprep.mubr.bf16.mxu1 %v214_v21  ;;  %1694 = vmatprep.mubr.bf16.mxu0 %v206_v22  ;;  %v57_v53 = vmul.f32 %v25_v46, %v25_v46  ;;  %v58_v56 = vmul.f32 %v26_v54, %v26_v54  ;;  %v59_v57 = vmul.f32 %v27_v55, %v27_v55  ;;  %v41_v5 = vld [vmem:[%s2914_s0 + $0xe8] sm:$0xff]  ;;  %v42_v7 = vld [vmem:[%s2914_s0 + $0xf0] sm:$0xff]  ;;  %v43_v8 = vld [vmem:[%s2914_s0 + $0xf8] sm:$0xff] }
   0xc   :  { %86 = vadd.xlane.f32.xlu1 %v49_v24  ;;  %v211_v58 = vpack.c.bf16 %v27_v55, %v26_v54  ;;  %v65_v0 = vmul.f32 %v1936_v14, %v1936_v14  ;;  %v66_v1 = vmul.f32 %v34_v27, %v34_v27  ;;  %v67_v2 = vmul.f32 %v1960_v28, %v1960_v28 }
   0xd   :  { %84 = vadd.xlane.f32.xlu0 %v48_v23  ;;  %v68_v3 = vmul.f32 %v1965_v29, %v1965_v29  ;;  %v218_v6 = vpack.c.bf16 %v41_v5, %v40_v4  ;;  %v219_v9 = vpack.c.bf16 %v43_v8, %v42_v7 }
  0x10   :  { %90 = vadd.xlane.f32.xlu1 %v51_v34 }
  0x11   :  { %88 = vadd.xlane.f32.xlu0 %v50_v33 }
  0x12   :  { %1695 = vmatmul.mubr.bf16.gmra.mxu0 %v207_v35  ;;  %1711 = vmatmul.mubr.bf16.gmra.mxu1 %v215_v36 }
  0x13   :  { %1714 = vmatprep.mubr.bf16.mxu1 %v216_v37  ;;  %1698 = vmatprep.mubr.bf16.mxu0 %v208_v38 }
  0x14   :  { %94 = vadd.xlane.f32.xlu1 %v53_v40 }
  0x15   :  { %92 = vadd.xlane.f32.xlu0 %v52_v39 }
  0x18   :  { %98 = vadd.xlane.f32.xlu1 %v55_v48 }
  0x19   :  { %96 = vadd.xlane.f32.xlu0 %v54_v47 }
  0x1a   :  { %1699 = vmatmul.mubr.bf16.gmra.mxu0 %v209_v49  ;;  %1715 = vmatmul.mubr.bf16.gmra.mxu1 %v217_v50 }
  0x1b   :  { %1702 = vmatprep.mubr.bf16.mxu0 %v210_v51  ;;  %1718 = vmatprep.mubr.bf16.mxu1 %v218_v6 }
  0x1c   :  { %102 = vadd.xlane.f32.xlu1 %v57_v53 }
  0x1d   :  { %100 = vadd.xlane.f32.xlu0 %v56_v52 }
  0x20   :  { %106 = vadd.xlane.f32.xlu1 %v59_v57 }
  0x21   :  { %104 = vadd.xlane.f32.xlu0 %v58_v56 }
  0x22   :  { %1703 = vmatmul.mubr.bf16.gmra.mxu0 %v211_v58  ;;  %1719 = vmatmul.mubr.bf16.gmra.mxu1 %v219_v9 }
  0x24   :  { %110 = vadd.xlane.f32.xlu1 %v61_v60 }
  0x25   :  { %108 = vadd.xlane.f32.xlu0 %v60_v59 }
  0x28   :  { %114 = vadd.xlane.f32.xlu1 %v63_v62 }
  0x29   :  { %112 = vadd.xlane.f32.xlu0 %v62_v61 }
  0x2c   :  { %118 = vadd.xlane.f32.xlu1 %v65_v0 }
  0x2d   :  { %116 = vadd.xlane.f32.xlu0 %v64_v63 }
  0x30   :  { %122 = vadd.xlane.f32.xlu1 %v67_v2 }
  0x31   :  { %120 = vadd.xlane.f32.xlu0 %v66_v1 }
  0x34   :  { %1617 = vadd.xlane.f32.xlu1 %v2916_v10 }
  0x35   :  { %124 = vadd.xlane.f32.xlu0 %v68_v3 }
  0x38   :  { %1623 = vadd.xlane.f32.xlu1 %v2916_v10 }
  0x39   :  { %1614 = vadd.xlane.f32.xlu0 %v2916_v10 }
  0x3d   :  { %1620 = vadd.xlane.f32.xlu0 %v2916_v10 }
  0x41   :  { %1626 = vadd.xlane.f32.xlu0 %v2916_v10 }
  0x8d   :  { %v81_v12 = vpop.xlane.xlu1 %80 }
  0x8e   :  { %v77_v11 = vpop.xlane.xlu0 %76  ;;  %v142_v31 = vmax.f32 %v81_v12, 1e-24 }
  0x8f   :  { %v140_v30 = vmax.f32 %v77_v11, 1e-24 }
  0x91   :  { %v83_v14 = vpop.xlane.xlu1 %82  ;;  %1725 = vrsqrt.f32 %v140_v30 }
  0x92   :  { %v79_v13 = vpop.xlane.xlu0 %78  ;;  %v143_v34 = vmax.f32 %v83_v14, 1e-24  ;;  %1727 = vrsqrt.f32 %v142_v31 }
  0x93   :  { %v141_v33 = vmax.f32 %v79_v13, 1e-24 }
  0x95   :  { %v87_v16 = vpop.xlane.xlu1 %86 }
  0x96   :  { %v85_v15 = vpop.xlane.xlu0 %84  ;;  %v145_v40 = vmax.f32 %v87_v16, 1e-24 }
  0x97   :  { %v144_v36 = vmax.f32 %v85_v15, 1e-24 }
  0x99   :  { %v91_v18 = vpop.xlane.xlu1 %90 }
  0x9a   :  { %v89_v17 = vpop.xlane.xlu0 %88  ;;  %v147_v42 = vmax.f32 %v91_v18, 1e-24 }
  0x9b   :  { %v146_v41 = vmax.f32 %v89_v17, 1e-24 }
  0x9d   :  { %v95_v20 = vpop.xlane.xlu1 %94 }
  0x9e   :  { %v93_v19 = vpop.xlane.xlu0 %92  ;;  %v149_v47 = vmax.f32 %v95_v20, 1e-24  ;;  %v1726_v52 = vpop.eup %1725 }
  0x9f   :  { %v148_v46 = vmax.f32 %v93_v19, 1e-24  ;;  %v1728_v54 = vpop.eup %1727 }
  0xa1   :  { %v99_v22 = vpop.xlane.xlu1 %98 }
  0xa2   :  { %v97_v21 = vpop.xlane.xlu0 %96  ;;  %v151_v50 = vmax.f32 %v99_v22, 1e-24 }
  0xa3   :  { %v150_v49 = vmax.f32 %v97_v21, 1e-24 }
  0xa5   :  { %v2035_v24 = vpop.xlane.xlu1 %102 }
  0xa6   :  { %v101_v23 = vpop.xlane.xlu0 %100  ;;  %v153_v13 = vmax.f32 %v2035_v24, 1e-24 }
  0xa7   :  { %v152_v55 = vmax.f32 %v101_v23, 1e-24 }
  0xa9   :  { %v2039_v26 = vpop.xlane.xlu1 %106 }
  0xaa   :  { %v2037_v25 = vpop.xlane.xlu0 %104 }
  0xab   :  { %v154_v22 = vmax.f32 %v2037_v25, 1e-24 }
  0xad   :  { %v111_v28 = vpop.xlane.xlu1 %110 }
  0xae   :  { %v109_v27 = vpop.xlane.xlu0 %108  ;;  %v157_v44 = vmax.f32 %v111_v28, 1e-24 }
  0xaf   :  { %v156_v38 = vmax.f32 %v109_v27, 1e-24 }
  0xb1   :  { %v115_v35 = vpop.xlane.xlu1 %114 }
  0xb2   :  { %v113_v29 = vpop.xlane.xlu0 %112  ;;  %v159_v39 = vmax.f32 %v115_v35, 1e-24 }
  0xb3   :  { %v158_v32 = vmax.f32 %v113_v29, 1e-24 }
  0xb5   :  { %1729 = vrsqrt.f32 %v158_v32  ;;  %v119_v43 = vpop.xlane.xlu1 %118 }
  0xb6   :  { %v117_v37 = vpop.xlane.xlu0 %116  ;;  %1731 = vrsqrt.f32 %v141_v33  ;;  %v161_v60 = vmax.f32 %v119_v43, 1e-24 }
  0xb7   :  { %1733 = vrsqrt.f32 %v143_v34  ;;  %v160_v53 = vmax.f32 %v117_v37, 1e-24 }
  0xb8   :  { %1735 = vrsqrt.f32 %v144_v36 }
  0xb9   :  { %1737 = vrsqrt.f32 %v156_v38  ;;  %v123_v51 = vpop.xlane.xlu1 %122 }
  0xba   :  { %1739 = vrsqrt.f32 %v159_v39  ;;  %v121_v45 = vpop.xlane.xlu0 %120  ;;  %v163_v57 = vmax.f32 %v123_v51, 1e-24 }
  0xbb   :  { %1741 = vrsqrt.f32 %v145_v40  ;;  %v162_v48 = vmax.f32 %v121_v45, 1e-24 }
  0xbc   :  { %1743 = vrsqrt.f32 %v146_v41 }
  0xbd   :  { %1745 = vrsqrt.f32 %v147_v42 }
  0xbe   :  { %1747 = vrsqrt.f32 %v157_v44  ;;  %v125_v11 = vpop.xlane.xlu0 %124 }
  0xbf   :  { %1749 = vrsqrt.f32 %v148_v46  ;;  %v164_v23 = vmax.f32 %v125_v11, 1e-24 }
  0xc0   :  { %1751 = vrsqrt.f32 %v149_v47 }
  0xc1   :  { %1753 = vrsqrt.f32 %v162_v48 }
  0xc2   :  { %v1730_v56 = vpop.eup %1729  ;;  %1755 = vrsqrt.f32 %v150_v49 }
  0xc3   :  { %v1732_v58 = vpop.eup %1731  ;;  %1757 = vrsqrt.f32 %v151_v50 }
  0xc4   :  { %v1734_v59 = vpop.eup %1733  ;;  %1759 = vrsqrt.f32 %v160_v53 }
  0xc5   :  { %v2041_v63 = vpop.eup %1735  ;;  %1761 = vrsqrt.f32 %v152_v55 }
  0xc6   :  { %v1738_v2 = vpop.eup %1737  ;;  %1763 = vrsqrt.f32 %v163_v57 }
  0xc7   :  { %v1740_v5 = vpop.eup %1739  ;;  %1765 = vrsqrt.f32 %v161_v60 }
  0xc8   :  { %v2043_v12 = vpop.eup %1741  ;;  %1767 = vrsqrt.f32 %v153_v13 }
  0xc9   :  { %v1744_v16 = vpop.eup %1743  ;;  %1769 = vrsqrt.f32 %v154_v22 }
  0xca   :  { %v1692_v61 = vpop.f32.mrf.mxu0  ;;  %v1708_v62 = vpop.f32.mrf.mxu1  ;;  %1771 = vrsqrt.f32 %v164_v23 }
  0xcb   :  { %v384_v0 = vmul.f32 %v1728_v54, %v1692_v61  ;;  %v400_v1 = vmul.f32 %v1730_v56, %v1708_v62  ;;  %v1746_v21 = vpop.eup %1745 }
  0xcc   :  { %v255_v3 = vpop.f32.mrf.mxu0  ;;  %v319_v4 = vpop.f32.mrf.mxu1 }
  0xcd   :  { %v416_v6 = vmul.f32 2.0, %v384_v0  ;;  %v432_v7 = vmul.f32 2.0, %v400_v1  ;;  %v382_v8 = vmul.f32 %v1726_v52, %v255_v3  ;;  %v398_v9 = vmul.f32 %v1738_v2, %v319_v4  ;;  %v1748_v31 = vpop.eup %1747 }
  0xce   :  { %v1693_v14 = vpop.f32.mrf.mxu0  ;;  %v1709_v15 = vpop.f32.mrf.mxu1  ;;  %v155_v2 = vmax.f32 %v2039_v26, 1e-24 }
  0xcf   :  { %v448_v17 = vsub.f32 2.0, %v416_v6  ;;  %v464_v18 = vsub.f32 2.0, %v432_v7  ;;  %v414_v19 = vmul.f32 2.0, %v382_v8  ;;  %v430_v20 = vmul.f32 2.0, %v398_v9  ;;  %v2047_v35 = vpop.eup %1749 }
  0xd0   :  { %v385_v27 = vmul.f32 %v1734_v59, %v1693_v14  ;;  %v401_v28 = vmul.f32 %v1740_v5, %v1709_v15  ;;  %v258_v29 = vpop.f32.mrf.mxu0  ;;  %v322_v30 = vpop.f32.mrf.mxu1 }
  0xd1   :  { %v480_v32 = vmax.f32 %v448_v17, 0.0  ;;  %v496_v33 = vmax.f32 %v464_v18, 0.0  ;;  %v446_v24 = vsub.f32 2.0, %v414_v19  ;;  %v462_v34 = vsub.f32 2.0, %v430_v20  ;;  %v2049_v42 = vpop.eup %1751 }
  0xd2   :  { %v417_v36 = vmul.f32 2.0, %v385_v27  ;;  %v433_v37 = vmul.f32 2.0, %v401_v28  ;;  %v383_v38 = vmul.f32 %v1732_v58, %v258_v29  ;;  %v399_v39 = vmul.f32 %v1748_v31, %v322_v30  ;;  %v1696_v40 = vpop.f32.mrf.mxu0  ;;  %v1712_v41 = vpop.f32.mrf.mxu1 }
  0xd3   :  { %v2051_v25 = vmin.f32 %v480_v32, 4.0  ;;  %v1754_v43 = vpop.eup %1753  ;;  %v478_v51 = vmax.f32 %v446_v24, 0.0  ;;  %v388_v52 = vmul.f32 %v1744_v16, %v1696_v40  ;;  %v2057_v54 = vmin.f32 %v496_v33, 4.0 }
  0xd4   :  { %v449_v44 = vsub.f32 2.0, %v417_v36  ;;  %v465_v45 = vsub.f32 2.0, %v433_v37  ;;  %v415_v46 = vmul.f32 2.0, %v383_v38  ;;  %v431_v47 = vmul.f32 2.0, %v399_v39  ;;  %v271_v48 = vpop.f32.mrf.mxu0  ;;  %v335_v49 = vpop.f32.mrf.mxu1 }
  0xd5   :  { %v2053_v50 = vpop.eup %1755  ;;  %v494_v55 = vmax.f32 %v462_v34, 0.0  ;;  %v420_v62 = vmul.f32 2.0, %v388_v52  ;;  %v404_v0 = vmul.f32 %v1754_v43, %v1712_v41  ;;  %1773 = vrsqrt.f32 %v2051_v25 }
  0xd6   :  { %v2055_v53 = vpop.eup %1757  ;;  %v447_v56 = vsub.f32 2.0, %v415_v46  ;;  %v1697_v57 = vpop.f32.mrf.mxu0  ;;  %v481_v60 = vmax.f32 %v449_v44, 0.0  ;;  %v463_v61 = vsub.f32 2.0, %v431_v47  ;;  %v497_v3 = vmax.f32 %v465_v45, 0.0 }
  0xd7   :  { %v1713_v58 = vpop.f32.mrf.mxu1  ;;  %v1760_v59 = vpop.eup %1759  ;;  %v2063_v7 = vmin.f32 %v478_v51, 4.0  ;;  %v452_v8 = vsub.f32 2.0, %v420_v62  ;;  %v436_v9 = vmul.f32 2.0, %v404_v0  ;;  %v386_v11 = vmul.f32 %v2041_v63, %v271_v48 }
  0xd8   :  { %v2059_v1 = vpop.eup %1761  ;;  %v274_v4 = vpop.f32.mrf.mxu0  ;;  %v2066_v13 = vmin.f32 %v494_v55, 4.0  ;;  %v479_v14 = vmax.f32 %v447_v56, 0.0  ;;  %v402_v15 = vmul.f32 %v1760_v59, %v335_v49  ;;  %v389_v16 = vmul.f32 %v1746_v21, %v1697_v57 }
  0xd9   :  { %v338_v5 = vpop.f32.mrf.mxu1  ;;  %v1764_v6 = vpop.eup %1763  ;;  %1775 = vrsqrt.f32 %v2057_v54  ;;  %v2069_v19 = vmin.f32 %v481_v60, 4.0  ;;  %v495_v20 = vmax.f32 %v463_v61, 0.0  ;;  %v468_v22 = vsub.f32 2.0, %v436_v9 }
  0xda   :  { %v1700_v17 = vpop.f32.mrf.mxu0  ;;  %v1766_v26 = vpop.eup %1765  ;;  %1777 = vrsqrt.f32 %v155_v2  ;;  %v2071_v23 = vmin.f32 %v497_v3, 4.0  ;;  %v484_v27 = vmax.f32 %v452_v8, 0.0  ;;  %v418_v28 = vmul.f32 2.0, %v386_v11 }
  0xdb   :  { %v1716_v18 = vpop.f32.mrf.mxu1  ;;  %1779 = vrsqrt.f32 %v2063_v7  ;;  %v434_v30 = vmul.f32 2.0, %v402_v15  ;;  %v421_v21 = vmul.f32 2.0, %v389_v16  ;;  %v405_v31 = vmul.f32 %v1764_v6, %v1713_v58  ;;  %v2081_v39 = vpop.eup %1767 }
  0xdc   :  { %v287_v63 = vpop.f32.mrf.mxu0  ;;  %1781 = vrsqrt.f32 %v2066_v13  ;;  %v2075_v32 = vmin.f32 %v479_v14, 4.0  ;;  %v387_v33 = vmul.f32 %v2043_v12, %v274_v4  ;;  %v2079_v36 = vmin.f32 %v495_v20, 4.0  ;;  %v1770_v49 = vpop.eup %1769 }
  0xdd   :  { %v351_v29 = vpop.f32.mrf.mxu1  ;;  %1783 = vrsqrt.f32 %v2069_v19  ;;  %v500_v37 = vmax.f32 %v468_v22, 0.0  ;;  %v403_v38 = vmul.f32 %v1766_v26, %v338_v5  ;;  %v2084_v40 = vmin.f32 %v484_v27, 4.0  ;;  %v1772_v51 = vpop.eup %1771 }
  0xde   :  { %v1701_v24 = vpop.f32.mrf.mxu0  ;;  %1785 = vrsqrt.f32 %v2071_v23  ;;  %v450_v41 = vsub.f32 2.0, %v418_v28  ;;  %v437_v43 = vmul.f32 2.0, %v405_v31  ;;  %v466_v46 = vsub.f32 2.0, %v434_v30 }
  0xdf   :  { %v1717_v34 = vpop.f32.mrf.mxu1  ;;  %v453_v12 = vsub.f32 2.0, %v421_v21  ;;  %v419_v47 = vmul.f32 2.0, %v387_v33  ;;  %v392_v48 = vmul.f32 %v2053_v50, %v1700_v17  ;;  %1787 = vrsqrt.f32 %v2075_v32 }
  0xe0   :  { %v290_v44 = vpop.f32.mrf.mxu0  ;;  %1789 = vrsqrt.f32 %v2079_v36  ;;  %v2089_v52 = vmin.f32 %v500_v37, 4.0  ;;  %v435_v55 = vmul.f32 2.0, %v403_v38  ;;  %v482_v57 = vmax.f32 %v450_v41, 0.0 }
  0xe1   :  { %v354_v45 = vpop.f32.mrf.mxu1  ;;  %v469_v58 = vsub.f32 2.0, %v437_v43  ;;  %v424_v59 = vmul.f32 2.0, %v392_v48  ;;  %v390_v60 = vmul.f32 %v2047_v35, %v287_v63  ;;  %1791 = vrsqrt.f32 %v2084_v40 }
  0xe2   :  { %v1704_v56 = vpop.f32.mrf.mxu0  ;;  %v1774_v61 = vpop.eup %1773  ;;  %v498_v62 = vmax.f32 %v466_v46, 0.0  ;;  %v485_v50 = vmax.f32 %v453_v12, 0.0  ;;  %v451_v0 = vsub.f32 2.0, %v419_v47  ;;  %1793 = vrsqrt.f32 %v2089_v52 }
  0xe3   :  { %v467_v2 = vsub.f32 2.0, %v435_v55  ;;  %v422_v3 = vmul.f32 2.0, %v390_v60  ;;  %v406_v4 = vmul.f32 %v1772_v51, %v351_v29  ;;  %v2094_v8 = vmin.f32 %v482_v57, 4.0 }
  0xe4   :  { %v303_v5 = vpop.f32.mrf.mxu0  ;;  %v501_v9 = vmax.f32 %v469_v58, 0.0  ;;  %v456_v11 = vsub.f32 2.0, %v424_v59  ;;  %v393_v14 = vmul.f32 %v2055_v53, %v1701_v24  ;;  %v2097_v15 = vmin.f32 %v498_v62, 4.0 }
  0xe5   :  { %v2099_v16 = vmin.f32 %v485_v50, 4.0  ;;  %v483_v17 = vmax.f32 %v451_v0, 0.0  ;;  %v438_v18 = vmul.f32 2.0, %v406_v4  ;;  %v557_v20 = vmul.f32 %v1774_v61, %v2051_v25 }
  0xe6   :  { %v1776_v6 = vpop.eup %1775  ;;  %v454_v22 = vsub.f32 2.0, %v422_v3  ;;  %v425_v27 = vmul.f32 2.0, %v393_v14  ;;  %v391_v28 = vmul.f32 %v2049_v42, %v290_v44  ;;  %v499_v30 = vmax.f32 %v467_v2, 0.0  ;;  %v1705_v31 = vpop.f32.mrf.mxu0 }
  0xe7   :  { %v1778_v35 = vpop.eup %1777  ;;  %v2104_v29 = vmul.f32 %v1776_v6, %v2057_v54  ;;  %v470_v53 = vsub.f32 2.0, %v438_v18  ;;  %v396_v21 = vmul.f32 %v1770_v49, %v1704_v56  ;;  %v2106_v24 = vmin.f32 %v501_v9, 4.0 }
  0xe8   :  { %v1780_v26 = vpop.eup %1779  ;;  %v488_v34 = vmax.f32 %v456_v11, 0.0  ;;  %v423_v37 = vmul.f32 2.0, %v391_v28  ;;  %v394_v38 = vmul.f32 %v2059_v1, %v303_v5  ;;  %1795 = vrsqrt.f32 %v2094_v8  ;;  %v306_v51 = vpop.f32.mrf.mxu0 }
  0xe9   :  { %v1782_v63 = vpop.eup %1781  ;;  %v2110_v43 = vmin.f32 %v483_v17, 4.0  ;;  %v457_v42 = vsub.f32 2.0, %v425_v27  ;;  %v428_v44 = vmul.f32 2.0, %v396_v21  ;;  %v2113_v45 = vmul.f32 %v1780_v26, %v2063_v7 }
  0xea   :  { %v1784_v33 = vpop.eup %1783  ;;  %1797 = vrsqrt.f32 %v2097_v15  ;;  %v486_v46 = vmax.f32 %v454_v22, 0.0  ;;  %v455_v12 = vsub.f32 2.0, %v423_v37  ;;  %v2117_v48 = vmin.f32 %v499_v30, 4.0 }
  0xeb   :  { %v1786_v41 = vpop.eup %1785  ;;  %1799 = vrsqrt.f32 %v2099_v16  ;;  %v502_v1 = vmax.f32 %v470_v53, 0.0  ;;  %v426_v49 = vmul.f32 2.0, %v394_v38  ;;  %v2120_v56 = vmul.f32 %v1782_v63, %v2066_v13 }
  0xec   :  { %v1788_v47 = vpop.eup %1787  ;;  %1801 = vrsqrt.f32 %v2106_v24  ;;  %v2123_v57 = vmin.f32 %v488_v34, 4.0  ;;  %v397_v58 = vmul.f32 %v1778_v35, %v1705_v31  ;;  %v564_v59 = vmul.f32 %v1784_v33, %v2069_v19 }
  0xed   :  { %v1790_v55 = vpop.eup %1789  ;;  %1803 = vrsqrt.f32 %v2110_v43  ;;  %v489_v60 = vmax.f32 %v457_v42, 0.0  ;;  %v460_v61 = vsub.f32 2.0, %v428_v44  ;;  %v676_v50 = vmul.f32 %v1786_v41, %v2071_v23 }
  0xee   :  { %v1792_v62 = vpop.eup %1791  ;;  %v2128_v0 = vmin.f32 %v486_v46, 4.0  ;;  %v487_v2 = vmax.f32 %v455_v12, 0.0  ;;  %v395_v3 = vmul.f32 %v2081_v39, %v306_v51  ;;  %v2132_v4 = vmul.f32 %v1788_v47, %v2075_v32 }
  0xef   :  { %1805 = vrsqrt.f32 %v2117_v48  ;;  %v2135_v5 = vmin.f32 %v502_v1, 4.0  ;;  %v458_v6 = vsub.f32 2.0, %v426_v49  ;;  %v1794_v9 = vpop.eup %1793  ;;  %v2138_v11 = vmul.f32 %v1790_v55, %v2079_v36 }
  0xf0   :  { %1807 = vrsqrt.f32 %v2123_v57  ;;  %v429_v14 = vmul.f32 2.0, %v397_v58  ;;  %vm558_vm0 = vcmp.eq.f32.partialorder %v2051_v25, inf  ;;  %v2143_v35 = vmul.f32 %v1792_v62, %v2084_v40 }
  0xf1   :  { %v2145_v39 = vmin.f32 %v489_v60, 4.0  ;;  %v492_v17 = vmax.f32 %v460_v61, 0.0  ;;  %v559_v18 = vsel %vm558_vm0, %v2051_v25, %v557_v20  ;;  %1809 = vrsqrt.f32 %v2128_v0 }
  0xf2   :  { %v2149_v26 = vmin.f32 %v487_v2, 4.0  ;;  %v427_v22 = vmul.f32 2.0, %v395_v3  ;;  %v561_v27 = vand.u32 2147483648, %v2051_v25  ;;  %1811 = vrsqrt.f32 %v2135_v5 }
  0xf3   :  { %v490_v28 = vmax.f32 %v458_v6, 0.0  ;;  %vm560_vm1 = vcmp.eq.f32.partialorder %v2051_v25, 0.0  ;;  %vm565_vm2 = vcmp.eq.f32.partialorder %v2069_v19, inf  ;;  %v461_v63 = vsub.f32 2.0, %v429_v14 }
  0xf4   :  { %v562_v30 = vsel %vm560_vm1, %v561_v27, %v559_v18  ;;  %v566_v53 = vsel %vm565_vm2, %v2069_v19, %v564_v59  ;;  %v568_v20 = vand.u32 2147483648, %v2069_v19  ;;  %1813 = vrsqrt.f32 %v2145_v39 }
  0xf5   :  { %v2158_v21 = vmin.f32 %v492_v17, 4.0  ;;  %v2160_v31 = vmul.f32 0.5, %v562_v30  ;;  %vm567_vm3 = vcmp.eq.f32.partialorder %v2069_v19, 0.0  ;;  %v1796_v33 = vpop.eup %1795  ;;  %1815 = vrsqrt.f32 %v2149_v26 }
  0xf6   :  { %v459_v25 = vsub.f32 2.0, %v427_v22  ;;  %v569_v34 = vsel %vm567_vm3, %v568_v20, %v566_v53  ;;  %vm670_vm4 = vcmp.eq.f32.partialorder %v2057_v54, inf  ;;  %v2171_v12 = vmin.f32 %v490_v28, 4.0 }
  0xf7   :  { %v1798_v37 = vpop.eup %1797  ;;  %v800_v38 = vmul.f32 -0.0187293, %v2160_v31  ;;  %v992_v41 = vsub.f32 1.0, %v2160_v31  ;;  %v2167_v42 = vmul.f32 0.5, %v569_v34  ;;  %v671_v44 = vsel %vm670_vm4, %v2057_v54, %v2104_v29 }
  0xf8   :  { %v1800_v46 = vpop.eup %1799  ;;  %v493_v19 = vmax.f32 %v461_v63, 0.0  ;;  %vm672_vm5 = vcmp.eq.f32.partialorder %v2057_v54, 0.0  ;;  %v673_v47 = vand.u32 2147483648, %v2057_v54  ;;  %vm677_vm6 = vcmp.eq.f32.partialorder %v2071_v23, inf }
  0xf9   :  { %v1802_v1 = vpop.eup %1801  ;;  %v832_v49 = vadd.f32 0.074261, %v800_v38  ;;  %v2175_v51 = vmax.f32 %v992_v41, 0.0  ;;  %v801_v55 = vmul.f32 -0.0187293, %v2167_v42  ;;  %v491_v59 = vmax.f32 %v459_v25, 0.0 }
  0xfa   :  { %v1804_v58 = vpop.eup %1803  ;;  %v993_v29 = vsub.f32 1.0, %v2167_v42  ;;  %v674_v60 = vsel %vm672_vm5, %v673_v47, %v671_v44  ;;  %v678_v61 = vsel %vm677_vm6, %v2071_v23, %v676_v50  ;;  %v2182_v62 = vmul.f32 %v1794_v9, %v2089_v52 }
  0xfb   :  { %v2185_v54 = vmul.f32 %v1796_v33, %v2094_v8  ;;  %1817 = vrsqrt.f32 %v2175_v51  ;;  %v680_v2 = vand.u32 2147483648, %v2071_v23  ;;  %v2190_v6 = vmin.f32 %v493_v19, 4.0 }
  0xfc   :  { %v1806_v3 = vpop.eup %1805  ;;  %1819 = vrsqrt.f32 %v2158_v21  ;;  %v833_v14 = vadd.f32 0.074261, %v801_v55  ;;  %vm679_vm7 = vcmp.eq.f32.partialorder %v2071_v23, 0.0  ;;  %v864_v50 = vmul.f32 %v832_v49, %v2160_v31 }
  0xfd   :  { %v1808_v17 = vpop.eup %1807  ;;  %v2194_v9 = vmax.f32 %v993_v29, 0.0  ;;  %v2196_v18 = vmul.f32 0.5, %v674_v60  ;;  %v681_v22 = vsel %vm679_vm7, %v680_v2, %v678_v61  ;;  %v2199_v27 = vmul.f32 %v1798_v37, %v2097_v15 }
  0xfe   :  { %1821 = vrsqrt.f32 %v2171_v12  ;;  %v2202_v28 = vmin.f32 %v491_v59, 4.0  ;;  %v2204_v63 = vmul.f32 0.5, %v681_v22  ;;  %v1810_v30 = vpop.eup %1809  ;;  %v2207_v23 = vmul.f32 %v1800_v46, %v2099_v16 }
  0xff   :  { %v2210_v53 = vmul.f32 %v1802_v1, %v2106_v24  ;;  %v865_v20 = vmul.f32 %v833_v14, %v2167_v42  ;;  %1823 = vrsqrt.f32 %v2194_v9  ;;  %v1812_v33 = vpop.eup %1811  ;;  %v2215_v25 = vmul.f32 %v1804_v58, %v2110_v43 }
 0x100   :  { %2920 = vst [vmem:[#allocation2_spill] sm:$0xff] %v2202_v28  ;;  %v2218_v34 = vmul.f32 %v1806_v3, %v2117_v48  ;;  %1825 = vrsqrt.f32 %v2190_v6  ;;  %vm544_vm8 = vcmp.eq.f32.partialorder %v2063_v7, inf  ;;  %v896_v37 = vadd.f32 -0.2121144, %v864_v50 }
 0x101   :  { %v816_v38 = vmul.f32 -0.0187293, %v2196_v18  ;;  %v1008_v41 = vsub.f32 1.0, %v2196_v18  ;;  %v1009_v44 = vsub.f32 1.0, %v2204_v63  ;;  %v1814_v46 = vpop.eup %1813  ;;  %v2226_v19 = vmul.f32 %v1808_v17, %v2123_v57 }
 0x102   :  { %1827 = vrsqrt.f32 %v2202_v28  ;;  %v817_v47 = vmul.f32 -0.0187293, %v2204_v63  ;;  %v545_v1 = vsel %vm544_vm8, %v2063_v7, %v2113_v45  ;;  %v2232_v49 = vpop.eup %1815  ;;  %v897_v55 = vadd.f32 -0.2121144, %v865_v20 }
 0x103   :  { %v2234_v58 = vmax.f32 %v1008_v41, 0.0  ;;  %v2236_v59 = vmax.f32 %v1009_v44, 0.0  ;;  %v547_v29 = vand.u32 2147483648, %v2063_v7  ;;  %v2240_v60 = vmul.f32 %v1810_v30, %v2128_v0 }
 0x104   :  { %v2243_v61 = vmul.f32 %v1812_v33, %v2135_v5  ;;  %v848_v2 = vadd.f32 0.074261, %v816_v38  ;;  %vm546_vm9 = vcmp.eq.f32.partialorder %v2063_v7, 0.0  ;;  %v928_v45 = vmul.f32 %v896_v37, %v2160_v31 }
 0x105   :  { %vm1070_vm10 = vcmp.eq.f32.partialorder %v2175_v51, inf  ;;  %1829 = vrsqrt.f32 %v2234_v58  ;;  %v548_v3 = vsel %vm546_vm9, %v547_v29, %v545_v1  ;;  %v2250_v14 = vmul.f32 %v1814_v46, %v2145_v39 }
 0x106   :  { %2921 = vst [vmem:[#allocation3_spill] sm:$0xff] %v2243_v61  ;;  %vm1072_vm11 = vcmp.eq.f32.partialorder %v2175_v51, 0.0  ;;  %v849_v17 = vadd.f32 0.074261, %v817_v47  ;;  %1831 = vrsqrt.f32 %v2236_v59  ;;  %v1073_v50 = vand.u32 2147483648, %v2175_v51 }
 0x107   :  { %v929_v22 = vmul.f32 %v897_v55, %v2167_v42  ;;  %vm1077_vm12 = vcmp.eq.f32.partialorder %v2194_v9, inf  ;;  %vm551_vm13 = vcmp.eq.f32.partialorder %v2075_v32, inf  ;;  %vm1079_vm14 = vcmp.eq.f32.partialorder %v2194_v9, 0.0 }
 0x108   :  { %v1818_v7 = vpop.eup %1817  ;;  %v880_v31 = vmul.f32 %v848_v2, %v2196_v18  ;;  %v2260_v30 = vmul.f32 0.5, %v548_v3  ;;  %v552_v20 = vsel %vm551_vm13, %v2075_v32, %v2132_v4  ;;  %v960_v37 = vadd.f32 1.5707288, %v928_v45 }
 0x109   :  { %v2264_v33 = vpop.eup %1819  ;;  %v1069_v38 = vmul.f32 %v1818_v7, %v2175_v51  ;;  %v1080_v42 = vand.u32 2147483648, %v2194_v9  ;;  %v554_v41 = vand.u32 2147483648, %v2075_v32  ;;  %v881_v44 = vmul.f32 %v849_v17, %v2204_v63 }
 0x10a   :  { %v798_v46 = vmul.f32 -0.0187293, %v2260_v30  ;;  %v990_v47 = vsub.f32 1.0, %v2260_v30  ;;  %vm553_vm0 = vcmp.eq.f32.partialorder %v2075_v32, 0.0  ;;  %v961_v55 = vadd.f32 1.5707288, %v929_v22 }
 0x10b   :  { %v2273_v1 = vpop.eup %1821  ;;  %v1071_v4 = vsel %vm1070_vm10, %v2175_v51, %v1069_v38  ;;  %v1185_v29 = vand.u32 2147483648, %v2234_v58  ;;  %v555_v2 = vsel %vm553_vm0, %v554_v41, %v552_v20  ;;  %v912_v17 = vadd.f32 -0.2121144, %v880_v31 }
 0x10c   :  { %v1824_v45 = vpop.eup %1823  ;;  %v1074_v3 = vsel %vm1072_vm11, %v1073_v50, %v1071_v4  ;;  %vm1182_vm1 = vcmp.eq.f32.partialorder %v2234_v58, inf  ;;  %v830_v7 = vadd.f32 0.074261, %v798_v46  ;;  %v2282_v10 = vmax.f32 %v990_v47, 0.0 }
 0x10d   :  { %v2284_v32 = vpop.eup %1825  ;;  %v1280_v28 = vmul.f32 %v1074_v3, %v960_v37  ;;  %v1076_v61 = vmul.f32 %v1824_v45, %v2194_v9  ;;  %vm1184_vm2 = vcmp.eq.f32.partialorder %v2234_v58, 0.0  ;;  %vm1189_vm3 = vcmp.eq.f32.partialorder %v2236_v59, inf }
 0x10e   :  { %v2289_v22 = vmul.f32 0.5, %v555_v2  ;;  %vm656_vm4 = vcmp.eq.f32.partialorder %v2066_v13, inf  ;;  %v913_v51 = vadd.f32 -0.2121144, %v881_v44  ;;  %v862_v50 = vmul.f32 %v830_v7, %v2260_v30 }
 0x10f   :  { %1833 = vrsqrt.f32 %v2282_v10  ;;  %v657_v31 = vsel %vm656_vm4, %v2066_v13, %v2120_v56  ;;  %v2296_v20 = vpop.eup %1827  ;;  %v1312_v37 = vsub.f32 1.5707964, %v1280_v28  ;;  %v1078_v38 = vsel %vm1077_vm12, %v2194_v9, %v1076_v61 }
 0x110   :  { %2922 = vst [vmem:[#allocation4_spill] sm:$0xff] %v2296_v20  ;;  %v799_v41 = vmul.f32 -0.0187293, %v2289_v22  ;;  %v659_v46 = vand.u32 2147483648, %v2066_v13  ;;  %v1081_v44 = vsel %vm1079_vm14, %v1080_v42, %v1078_v38  ;;  %v944_v47 = vmul.f32 %v912_v17, %v2196_v18 }
 0x111   :  { %v991_v4 = vsub.f32 1.0, %v2289_v22  ;;  %vm658_vm5 = vcmp.eq.f32.partialorder %v2066_v13, 0.0  ;;  %v1344_v56 = vmul.f32 2.0, %v1312_v37  ;;  %v1281_v2 = vmul.f32 %v1081_v44, %v961_v55 }
 0x112   :  { %v831_v28 = vadd.f32 0.074261, %v799_v41  ;;  %v660_v45 = vsel %vm658_vm5, %v659_v46, %v657_v31  ;;  %v1830_v3 = vpop.eup %1829  ;;  %v945_v61 = vmul.f32 %v913_v51, %v2204_v63  ;;  %vm1191_vm6 = vcmp.eq.f32.partialorder %v2236_v59, 0.0 }
 0x113   :  { %v894_v7 = vadd.f32 -0.2121144, %v862_v50  ;;  %v2310_v20 = vmax.f32 %v991_v4, 0.0  ;;  %v1832_v9 = vpop.eup %1831  ;;  %v1376_v42 = vmul.f32 %v1344_v56, %v1312_v37  ;;  %v1313_v38 = vsub.f32 1.5707964, %v1281_v2 }
 0x114   :  { %v1181_v18 = vmul.f32 %v1830_v3, %v2234_v58  ;;  %v1192_v17 = vand.u32 2147483648, %v2236_v59  ;;  %v976_v13 = vadd.f32 1.5707288, %v944_v47  ;;  %v1188_v55 = vmul.f32 %v1832_v9, %v2236_v59 }
 0x115   :  { %1835 = vrsqrt.f32 %v2310_v20  ;;  %v2316_v31 = vmul.f32 0.5, %v660_v45  ;;  %v1544_v63 = vsel %vm1537_vm15, %v1376_v42, 0.0  ;;  %v1345_v51 = vmul.f32 2.0, %v1313_v38 }
 0x116   :  { %v1183_v50 = vsel %vm1182_vm1, %v2234_v58, %v1181_v18  ;;  %v863_v37 = vmul.f32 %v831_v28, %v2289_v22  ;;  %1545 = vadd.xlane.f32.xlu1 %v1544_v63  ;;  %v977_v46 = vadd.f32 1.5707288, %v945_v61  ;;  %v1190_v44 = vsel %vm1189_vm3, %v2236_v59, %v1188_v55 }
 0x117   :  { %v1186_v41 = vsel %vm1184_vm2, %v1185_v29, %v1183_v50  ;;  %v926_v47 = vmul.f32 %v894_v7, %v2260_v30  ;;  %v1377_v4 = vmul.f32 %v1345_v51, %v1313_v38  ;;  %v1193_v2 = vsel %vm1191_vm6, %v1192_v17, %v1190_v44 }
 0x118   :  { %v1296_v56 = vmul.f32 %v1186_v41, %v976_v13  ;;  %vm663_vm7 = vcmp.eq.f32.partialorder %v2079_v36, inf  ;;  %v1297_v45 = vmul.f32 %v1193_v2, %v977_v46  ;;  %v814_v28 = vmul.f32 -0.0187293, %v2316_v31 }
 0x119   :  { %v1006_v58 = vsub.f32 1.0, %v2316_v31  ;;  %v664_v29 = vsel %vm663_vm7, %v2079_v36, %v2138_v11  ;;  %v1547_v3 = vsel %vm1537_vm15, %v1377_v4, 0.0  ;;  %v895_v9 = vadd.f32 -0.2121144, %v863_v37 }
 0x11a   :  { %v1328_v61 = vsub.f32 1.5707964, %v1296_v56  ;;  %v666_v30 = vand.u32 2147483648, %v2079_v36  ;;  %1548 = vadd.xlane.f32.xlu0 %v1547_v3  ;;  %v1329_v7 = vsub.f32 1.5707964, %v1297_v45  ;;  %vm1056_vm8 = vcmp.eq.f32.partialorder %v2282_v10, inf }
 0x11b   :  { %v2339_v59 = vmax.f32 %v1006_v58, 0.0  ;;  %vm665_vm9 = vcmp.eq.f32.partialorder %v2079_v36, 0.0  ;;  %vm1058_vm10 = vcmp.eq.f32.partialorder %v2282_v10, 0.0  ;;  %v1059_v11 = vand.u32 2147483648, %v2282_v10 }
 0x11c   :  { %v1834_v42 = vpop.eup %1833  ;;  %v1360_v38 = vmul.f32 2.0, %v1328_v61  ;;  %v667_v18 = vsel %vm665_vm9, %v666_v30, %v664_v29  ;;  %v1361_v17 = vmul.f32 2.0, %v1329_v7  ;;  %v846_v55 = vadd.f32 0.074261, %v814_v28 }
 0x11d   :  { %v1055_v13 = vmul.f32 %v1834_v42, %v2282_v10  ;;  %1837 = vrsqrt.f32 %v2339_v59  ;;  %v958_v51 = vadd.f32 1.5707288, %v926_v47  ;;  %v927_v50 = vmul.f32 %v895_v9, %v2289_v22 }
 0x11e   :  { %v1392_v63 = vmul.f32 %v1360_v38, %v1328_v61  ;;  %vm586_vm11 = vcmp.eq.f32.partialorder %v2084_v40, inf  ;;  %v1393_v36 = vmul.f32 %v1361_v17, %v1329_v7  ;;  %v2351_v41 = vmul.f32 0.5, %v667_v18 }
 0x11f   :  { %v1057_v37 = vsel %vm1056_vm8, %v2282_v10, %v1055_v13  ;;  %v587_v46 = vsel %vm586_vm11, %v2084_v40, %v2143_v35  ;;  %vm588_vm12 = vcmp.eq.f32.partialorder %v2084_v40, 0.0  ;;  %v589_v22 = vand.u32 2147483648, %v2084_v40 }
 0x120   :  { %v1592_v44 = vsel %vm1537_vm15, %v1392_v63, 0.0  ;;  %v1060_v4 = vsel %vm1058_vm10, %v1059_v11, %v1057_v37  ;;  %v1595_v47 = vsel %vm1537_vm15, %v1393_v36, 0.0  ;;  %v878_v2 = vmul.f32 %v846_v55, %v2316_v31 }
 0x121   :  { %1593 = vadd.xlane.f32.xlu1 %v1592_v44  ;;  %v1278_v56 = vmul.f32 %v1060_v4, %v958_v51  ;;  %v815_v45 = vmul.f32 -0.0187293, %v2351_v41  ;;  %1596 = vadd.xlane.f32.xlu0 %v1595_v47  ;;  %vm1063_vm13 = vcmp.eq.f32.partialorder %v2310_v20, inf  ;;  %vm1065_vm14 = vcmp.eq.f32.partialorder %v2310_v20, 0.0 }
 0x122   :  { %v1836_v28 = vpop.eup %1835  ;;  %v1007_v10 = vsub.f32 1.0, %v2351_v41  ;;  %v590_v35 = vsel %vm588_vm12, %v589_v22, %v587_v46  ;;  %v1066_v29 = vand.u32 2147483648, %v2310_v20  ;;  %v959_v61 = vadd.f32 1.5707288, %v927_v50 }
 0x123   :  { %v1310_v58 = vsub.f32 1.5707964, %v1278_v56  ;;  %v1062_v40 = vmul.f32 %v1836_v28, %v2310_v20  ;;  %v847_v3 = vadd.f32 0.074261, %v815_v45  ;;  %v2370_v30 = vmul.f32 0.5, %v590_v35 }
 0x124   :  { %v2368_v9 = vmax.f32 %v1007_v10, 0.0  ;;  %vm593_vm0 = vcmp.eq.f32.partialorder %v2099_v16, inf  ;;  %v910_v38 = vadd.f32 -0.2121144, %v878_v2  ;;  %v596_v13 = vand.u32 2147483648, %v2099_v16 }
 0x125   :  { %v1342_v7 = vmul.f32 2.0, %v1310_v58  ;;  %v1064_v42 = vsel %vm1063_vm13, %v2310_v20, %v1062_v40  ;;  %v594_v11 = vsel %vm593_vm0, %v2099_v16, %v2207_v23  ;;  %v879_v17 = vmul.f32 %v847_v3, %v2351_v41 }
 0x126   :  { %v1067_v18 = vsel %vm1065_vm14, %v1066_v29, %v1064_v42  ;;  %1839 = vrsqrt.f32 %v2368_v9  ;;  %vm1168_vm1 = vcmp.eq.f32.partialorder %v2339_v59, inf  ;;  %vm595_vm2 = vcmp.eq.f32.partialorder %v2099_v16, 0.0 }
 0x127   :  { %v1374_v55 = vmul.f32 %v1342_v7, %v1310_v58  ;;  %v1279_v63 = vmul.f32 %v1067_v18, %v959_v61  ;;  %vm1170_vm3 = vcmp.eq.f32.partialorder %v2339_v59, 0.0  ;;  %v804_v20 = vmul.f32 -0.0187293, %v2370_v30 }
 0x128   :  { %v996_v51 = vsub.f32 1.0, %v2370_v30  ;;  %v597_v23 = vsel %vm595_vm2, %v596_v13, %v594_v11  ;;  %v942_v37 = vmul.f32 %v910_v38, %v2316_v31  ;;  %v911_v4 = vadd.f32 -0.2121144, %v879_v17 }
 0x129   :  { %v1538_v50 = vsel %vm1537_vm15, %v1374_v55, 0.0  ;;  %v1311_v36 = vsub.f32 1.5707964, %v1279_v63  ;;  %v2386_v46 = vmul.f32 0.5, %v597_v23  ;;  %v836_v22 = vadd.f32 0.074261, %v804_v20 }
 0x12a   :  { %v1838_v44 = vpop.eup %1837  ;;  %1539 = vadd.xlane.f32.xlu1 %v1538_v50  ;;  %v2388_v47 = vmax.f32 %v996_v51, 0.0  ;;  %vm698_vm4 = vcmp.eq.f32.partialorder %v2089_v52, inf  ;;  %v1171_v31 = vand.u32 2147483648, %v2339_v59  ;;  %v701_v10 = vand.u32 2147483648, %v2089_v52 }
 0x12b   :  { %v1343_v16 = vmul.f32 2.0, %v1311_v36  ;;  %v1167_v56 = vmul.f32 %v1838_v44, %v2339_v59  ;;  %v805_v2 = vmul.f32 -0.0187293, %v2386_v46  ;;  %v699_v45 = vsel %vm698_vm4, %v2089_v52, %v2182_v62 }
 0x12c   :  { %v868_v28 = vmul.f32 %v836_v22, %v2370_v30  ;;  %1841 = vrsqrt.f32 %v2388_v47  ;;  %v974_v58 = vadd.f32 1.5707288, %v942_v37  ;;  %vm700_vm5 = vcmp.eq.f32.partialorder %v2089_v52, 0.0 }
 0x12d   :  { %v1375_v35 = vmul.f32 %v1343_v16, %v1311_v36  ;;  %v1169_v40 = vsel %vm1168_vm1, %v2339_v59, %v1167_v56  ;;  %v943_v62 = vmul.f32 %v911_v4, %v2351_v41  ;;  %v997_v3 = vsub.f32 1.0, %v2386_v46 }
 0x12e   :  { %v1172_v29 = vsel %vm1170_vm3, %v1171_v31, %v1169_v40  ;;  %v702_v61 = vsel %vm700_vm5, %v701_v10, %v699_v45  ;;  %v837_v38 = vadd.f32 0.074261, %v805_v2  ;;  %v2412_v18 = vmul.f32 %v2232_v49, %v2149_v26 }
 0x12f   :  { %v1541_v7 = vsel %vm1537_vm15, %v1375_v35, 0.0  ;;  %v1294_v42 = vmul.f32 %v1172_v29, %v974_v58  ;;  %v2408_v11 = vmul.f32 0.5, %v702_v61  ;;  %v2416_v52 = vmul.f32 %v2264_v33, %v2158_v21 }
 0x130   :  { %1542 = vadd.xlane.f32.xlu0 %v1541_v7  ;;  %v900_v59 = vadd.f32 -0.2121144, %v868_v28  ;;  %v2418_v41 = vmax.f32 %v997_v3, 0.0  ;;  %vm1175_vm6 = vcmp.eq.f32.partialorder %v2368_v9, inf  ;;  %vm1177_vm7 = vcmp.eq.f32.partialorder %v2368_v9, 0.0 }
 0x131   :  { %v1326_v17 = vsub.f32 1.5707964, %v1294_v42  ;;  %v820_v13 = vmul.f32 -0.0187293, %v2408_v11  ;;  %v975_v55 = vadd.f32 1.5707288, %v943_v62  ;;  %v869_v20 = vmul.f32 %v837_v38, %v2386_v46 }
 0x132   :  { %v1178_v63 = vand.u32 2147483648, %v2368_v9  ;;  %1843 = vrsqrt.f32 %v2418_v41  ;;  %vm705_vm8 = vcmp.eq.f32.partialorder %v2106_v24, inf  ;;  %vm1098_vm9 = vcmp.eq.f32.partialorder %v2388_v47, inf }
 0x133   :  { %v1840_v49 = vpop.eup %1839  ;;  %v1358_v33 = vmul.f32 2.0, %v1326_v17  ;;  %v706_v51 = vsel %vm705_vm8, %v2106_v24, %v2210_v53  ;;  %v932_v50 = vmul.f32 %v900_v59, %v2370_v30  ;;  %v1012_v36 = vsub.f32 1.0, %v2408_v11 }
 0x134   :  { %v1174_v23 = vmul.f32 %v1840_v49, %v2368_v9  ;;  %v708_v37 = vand.u32 2147483648, %v2106_v24  ;;  %vm1100_vm10 = vcmp.eq.f32.partialorder %v2388_v47, 0.0  ;;  %v852_v4 = vadd.f32 0.074261, %v820_v13 }
 0x135   :  { %v1390_v44 = vmul.f32 %v1358_v33, %v1326_v17  ;;  %vm707_vm11 = vcmp.eq.f32.partialorder %v2106_v24, 0.0  ;;  %v1101_v53 = vand.u32 2147483648, %v2388_v47  ;;  %v2440_v16 = vmax.f32 %v1012_v36, 0.0 }
 0x136   :  { %v1176_v22 = vsel %vm1175_vm6, %v2368_v9, %v1174_v23  ;;  %v709_v56 = vsel %vm707_vm11, %v708_v37, %v706_v51  ;;  %v901_v45 = vadd.f32 -0.2121144, %v869_v20  ;;  %v964_v24 = vadd.f32 1.5707288, %v932_v50 }
 0x137   :  { %v1586_v30 = vsel %vm1537_vm15, %v1390_v44, 0.0  ;;  %v1179_v2 = vsel %vm1177_vm7, %v1178_v63, %v1176_v22  ;;  %v2445_v31 = vmul.f32 0.5, %v709_v56  ;;  %1845 = vrsqrt.f32 %v2440_v16  ;;  %v1720_v22 = vpop.f32.mrf.mxu1 }
 0x138   :  { %1587 = vadd.xlane.f32.xlu1 %v1586_v30  ;;  %v1295_v28 = vmul.f32 %v1179_v2, %v975_v55  ;;  %vm572_vm12 = vcmp.eq.f32.partialorder %v2094_v8, inf  ;;  %v884_v35 = vmul.f32 %v852_v4, %v2408_v11  ;;  %vm1105_vm13 = vcmp.eq.f32.partialorder %v2418_v41, inf }
 0x139   :  { %v1842_v10 = vpop.eup %1841  ;;  %v821_v58 = vmul.f32 -0.0187293, %v2445_v31  ;;  %v1013_v40 = vsub.f32 1.0, %v2445_v31  ;;  %v573_v9 = vsel %vm572_vm12, %v2094_v8, %v2185_v54  ;;  %v575_v3 = vand.u32 2147483648, %v2094_v8 }
 0x13a   :  { %v1327_v29 = vsub.f32 1.5707964, %v1295_v28  ;;  %v1097_v62 = vmul.f32 %v1842_v10, %v2388_v47  ;;  %v933_v61 = vmul.f32 %v901_v45, %v2386_v46  ;;  %vm574_vm14 = vcmp.eq.f32.partialorder %v2094_v8, 0.0  ;;  %v367_v28 = vpop.f32.mrf.mxu1 }
 0x13b   :  { %v853_v7 = vadd.f32 0.074261, %v821_v58  ;;  %v2458_v42 = vmax.f32 %v1013_v40, 0.0  ;;  %vm1107_vm0 = vcmp.eq.f32.partialorder %v2418_v41, 0.0  ;;  %v576_v54 = vsel %vm574_vm14, %v575_v3, %v573_v9 }
 0x13c   :  { %v1359_v38 = vmul.f32 2.0, %v1327_v29  ;;  %v1099_v59 = vsel %vm1098_vm9, %v2388_v47, %v1097_v62  ;;  %v916_v13 = vadd.f32 -0.2121144, %v884_v35  ;;  %vm579_vm1 = vcmp.eq.f32.partialorder %v2110_v43, inf }
 0x13d   :  { %v1102_v17 = vsel %vm1100_vm10, %v1101_v53, %v1099_v59  ;;  %1847 = vrsqrt.f32 %v2458_v42  ;;  %v1108_v8 = vand.u32 2147483648, %v2418_v41  ;;  %v580_v63 = vsel %vm579_vm1, %v2110_v43, %v2215_v25 }
 0x13e   :  { %v1391_v46 = vmul.f32 %v1359_v38, %v1327_v29  ;;  %v1284_v55 = vmul.f32 %v1102_v17, %v964_v24  ;;  %v965_v33 = vadd.f32 1.5707288, %v933_v61  ;;  %v885_v20 = vmul.f32 %v853_v7, %v2445_v31 }
 0x13f   :  { %v1844_v49 = vpop.eup %1843  ;;  %v2473_v51 = vmul.f32 0.5, %v576_v54  ;;  %v582_v47 = vand.u32 2147483648, %v2110_v43  ;;  %vm581_vm2 = vcmp.eq.f32.partialorder %v2110_v43, 0.0  ;;  %v948_v37 = vmul.f32 %v916_v13, %v2408_v11 }
 0x140   :  { %v1589_v23 = vsel %vm1537_vm15, %v1391_v46, 0.0  ;;  %v1316_v50 = vsub.f32 1.5707964, %v1284_v55  ;;  %v1104_v36 = vmul.f32 %v1844_v49, %v2418_v41  ;;  %vm1210_vm3 = vcmp.eq.f32.partialorder %v2440_v16, inf }
 0x141   :  { %1590 = vadd.xlane.f32.xlu0 %v1589_v23  ;;  %v802_v25 = vmul.f32 -0.0187293, %v2473_v51  ;;  %v994_v44 = vsub.f32 1.0, %v2473_v51  ;;  %v583_v4 = vsel %vm581_vm2, %v582_v47, %v580_v63  ;;  %v917_v2 = vadd.f32 -0.2121144, %v885_v20 }
 0x142   :  { %v1348_v53 = vmul.f32 2.0, %v1316_v50  ;;  %v1106_v56 = vsel %vm1105_vm13, %v2418_v41, %v1104_v36  ;;  %v2486_v30 = vmul.f32 0.5, %v583_v4  ;;  %v980_v9 = vadd.f32 1.5707288, %v948_v37  ;;  %v1721_v41 = vpop.f32.mrf.mxu1 }
 0x143   :  { %v1109_v43 = vsel %vm1107_vm0, %v1108_v8, %v1106_v56  ;;  %v834_v11 = vadd.f32 0.074261, %v802_v25  ;;  %v2490_v45 = vmax.f32 %v994_v44, 0.0  ;;  %vm1212_vm4 = vcmp.eq.f32.partialorder %v2440_v16, 0.0 }
 0x144   :  { %v1380_v24 = vmul.f32 %v1348_v53, %v1316_v50  ;;  %v1285_v10 = vmul.f32 %v1109_v43, %v965_v33  ;;  %v803_v35 = vmul.f32 -0.0187293, %v2486_v30  ;;  %v995_v58 = vsub.f32 1.0, %v2486_v30  ;;  %v1846_v40 = vpop.eup %1845  ;;  %v370_v54 = vpop.f32.mrf.mxu1 }
 0x145   :  { %v1213_v29 = vand.u32 2147483648, %v2440_v16  ;;  %1849 = vrsqrt.f32 %v2490_v45  ;;  %v1209_v61 = vmul.f32 %v1846_v40, %v2440_v16  ;;  %v866_v7 = vmul.f32 %v834_v11, %v2473_v51 }
 0x146   :  { %v1556_v62 = vsel %vm1537_vm15, %v1380_v24, 0.0  ;;  %v1317_v3 = vsub.f32 1.5707964, %v1285_v10  ;;  %v949_v38 = vmul.f32 %v917_v2, %v2445_v31  ;;  %vm1217_vm5 = vcmp.eq.f32.partialorder %v2458_v42, inf }
 0x147   :  { %1557 = vadd.xlane.f32.xlu1 %v1556_v62  ;;  %vm1219_vm6 = vcmp.eq.f32.partialorder %v2458_v42, 0.0  ;;  %v2503_v59 = vmax.f32 %v995_v58, 0.0  ;;  %v1211_v13 = vsel %vm1210_vm3, %v2440_v16, %v1209_v61  ;;  %v835_v46 = vadd.f32 0.074261, %v803_v35 }
 0x148   :  { %v1349_v17 = vmul.f32 2.0, %v1317_v3  ;;  %vm684_vm7 = vcmp.eq.f32.partialorder %v2097_v15, inf  ;;  %v1214_v55 = vsel %vm1212_vm4, %v1213_v29, %v1211_v13  ;;  %v1220_v31 = vand.u32 2147483648, %v2458_v42 }
 0x149   :  { %1851 = vrsqrt.f32 %v2503_v59  ;;  %v685_v8 = vsel %vm684_vm7, %v2097_v15, %v2199_v27  ;;  %v1300_v33 = vmul.f32 %v1214_v55, %v980_v9  ;;  %v898_v20 = vadd.f32 -0.2121144, %v866_v7 }
 0x14a   :  { %v1848_v63 = vpop.eup %1847  ;;  %v1381_v49 = vmul.f32 %v1349_v17, %v1317_v3  ;;  %v687_v47 = vand.u32 2147483648, %v2097_v15  ;;  %v981_v23 = vadd.f32 1.5707288, %v949_v38  ;;  %vm686_vm8 = vcmp.eq.f32.partialorder %v2097_v15, 0.0 }
 0x14b   :  { %v1216_v50 = vmul.f32 %v1848_v63, %v2458_v42  ;;  %vm691_vm9 = vcmp.eq.f32.partialorder %v2117_v48, inf  ;;  %v1332_v36 = vsub.f32 1.5707964, %v1300_v33  ;;  %vm1084_vm10 = vcmp.eq.f32.partialorder %v2490_v45, inf }
 0x14c   :  { %v1559_v16 = vsel %vm1537_vm15, %v1381_v49, 0.0  ;;  %v867_v27 = vmul.f32 %v835_v46, %v2486_v30  ;;  %v688_v37 = vsel %vm686_vm8, %v687_v47, %v685_v8  ;;  %vm1086_vm11 = vcmp.eq.f32.partialorder %v2490_v45, 0.0 }
 0x14d   :  { %1560 = vadd.xlane.f32.xlu0 %v1559_v16  ;;  %v1218_v25 = vsel %vm1217_vm5, %v2458_v42, %v1216_v50  ;;  %v2526_v44 = vmul.f32 0.5, %v688_v37  ;;  %v692_v15 = vsel %vm691_vm9, %v2117_v48, %v2218_v34  ;;  %vm693_vm12 = vcmp.eq.f32.partialorder %v2117_v48, 0.0 }
 0x14e   :  { %v1364_v4 = vmul.f32 2.0, %v1332_v36  ;;  %v1221_v22 = vsel %vm1219_vm6, %v1220_v31, %v1218_v25  ;;  %v930_v53 = vmul.f32 %v898_v20, %v2473_v51  ;;  %v694_v56 = vand.u32 2147483648, %v2117_v48 }
 0x14f   :  { %v1301_v43 = vmul.f32 %v1221_v22, %v981_v23  ;;  %v818_v2 = vmul.f32 -0.0187293, %v2526_v44  ;;  %v1010_v11 = vsub.f32 1.0, %v2526_v44  ;;  %vm614_vm13 = vcmp.eq.f32.partialorder %v2123_v57, inf }
 0x150   :  { %v1396_v28 = vmul.f32 %v1364_v4, %v1332_v36  ;;  %v899_v24 = vadd.f32 -0.2121144, %v867_v27  ;;  %v695_v34 = vsel %vm693_vm12, %v694_v56, %v692_v15  ;;  %v615_v10 = vsel %vm614_vm13, %v2123_v57, %v2226_v19 }
 0x151   :  { %v1333_v35 = vsub.f32 1.5707964, %v1301_v43  ;;  %v2540_v42 = vmax.f32 %v1010_v11, 0.0  ;;  %v2542_v58 = vmul.f32 0.5, %v695_v34  ;;  %v617_v48 = vand.u32 2147483648, %v2123_v57 }
 0x152   :  { %v1850_v51 = vpop.eup %1849  ;;  %v1604_v40 = vsel %vm1537_vm15, %v1396_v28, 0.0  ;;  %v1087_v9 = vand.u32 2147483648, %v2490_v45  ;;  %v850_v29 = vadd.f32 0.074261, %v818_v2  ;;  %vm616_vm14 = vcmp.eq.f32.partialorder %v2123_v57, 0.0 }
 0x153   :  { %1605 = vadd.xlane.f32.xlu1 %v1604_v40  ;;  %v1365_v41 = vmul.f32 2.0, %v1333_v35  ;;  %v1083_v62 = vmul.f32 %v1850_v51, %v2490_v45  ;;  %1853 = vrsqrt.f32 %v2540_v42  ;;  %v618_v19 = vsel %vm616_vm14, %v617_v48, %v615_v10 }
 0x154   :  { %v931_v3 = vmul.f32 %v899_v24, %v2486_v30  ;;  %vm1091_vm0 = vcmp.eq.f32.partialorder %v2503_v59, inf  ;;  %vm1093_vm1 = vcmp.eq.f32.partialorder %v2503_v59, 0.0  ;;  %v819_v61 = vmul.f32 -0.0187293, %v2542_v58 }
 0x155   :  { %v1397_v7 = vmul.f32 %v1365_v41, %v1333_v35  ;;  %v962_v38 = vadd.f32 1.5707288, %v930_v53  ;;  %v1085_v57 = vsel %vm1084_vm10, %v2490_v45, %v1083_v62  ;;  %v1011_v54 = vsub.f32 1.0, %v2542_v58 }
 0x156   :  { %v1852_v17 = vpop.eup %1851  ;;  %v1088_v13 = vsel %vm1086_vm11, %v1087_v9, %v1085_v57  ;;  %v1094_v30 = vand.u32 2147483648, %v2503_v59  ;;  %v851_v46 = vadd.f32 0.074261, %v819_v61  ;;  %v2561_v55 = vmul.f32 0.5, %v618_v19 }
 0x157   :  { %v1607_v31 = vsel %vm1537_vm15, %v1397_v7, 0.0  ;;  %v1282_v8 = vmul.f32 %v1088_v13, %v962_v38  ;;  %v1090_v63 = vmul.f32 %v1852_v17, %v2503_v59  ;;  %v882_v49 = vmul.f32 %v850_v29, %v2526_v44 }
 0x158   :  { %1608 = vadd.xlane.f32.xlu0 %v1607_v31  ;;  %v963_v33 = vadd.f32 1.5707288, %v931_v3  ;;  %v2566_v20 = vmax.f32 %v1011_v54, 0.0  ;;  %v1000_v47 = vsub.f32 1.0, %v2561_v55  ;;  %vm621_vm2 = vcmp.eq.f32.partialorder %v2145_v39, inf }
 0x159   :  { %v1314_v45 = vsub.f32 1.5707964, %v1282_v8  ;;  %v1092_v23 = vsel %vm1091_vm0, %v2503_v59, %v1090_v63  ;;  %v883_v50 = vmul.f32 %v851_v46, %v2542_v58  ;;  %v622_v16 = vsel %vm621_vm2, %v2145_v39, %v2250_v14 }
 0x15a   :  { %v1095_v36 = vsel %vm1093_vm1, %v1094_v30, %v1092_v23  ;;  %1855 = vrsqrt.f32 %v2566_v20  ;;  %v808_v27 = vmul.f32 -0.0187293, %v2561_v55  ;;  %v624_v37 = vand.u32 2147483648, %v2145_v39 }
 0x15b   :  { %v1346_v25 = vmul.f32 2.0, %v1314_v45  ;;  %v1283_v15 = vmul.f32 %v1095_v36, %v963_v33  ;;  %v914_v4 = vadd.f32 -0.2121144, %v882_v49  ;;  %vm623_vm3 = vcmp.eq.f32.partialorder %v2145_v39, 0.0 }
 0x15c   :  { %v2584_v22 = vmul.f32 %v2273_v1, %v2171_v12  ;;  %v2588_v14 = vmul.f32 %v2284_v32, %v2190_v6  ;;  %v2590_v59 = vmax.f32 %v1000_v47, 0.0  ;;  %v625_v53 = vsel %vm623_vm3, %v624_v37, %v622_v16 }
 0x15d   :  { %v1378_v56 = vmul.f32 %v1346_v25, %v1314_v45  ;;  %v1315_v43 = vsub.f32 1.5707964, %v1283_v15  ;;  %v915_v2 = vadd.f32 -0.2121144, %v883_v50  ;;  %v2592_v11 = vmul.f32 0.5, %v625_v53  ;;  %v2923_v45 = vld [vmem:[#allocation3_spill] sm:$0xff] }
 0x15e   :  { %vm1196_vm4 = vcmp.eq.f32.partialorder %v2540_v42, inf  ;;  %vm1198_vm5 = vcmp.eq.f32.partialorder %v2540_v42, 0.0  ;;  %v840_v39 = vadd.f32 0.074261, %v808_v27  ;;  %1857 = vrsqrt.f32 %v2590_v59 }
 0x15f   :  { %v1550_v1 = vsel %vm1537_vm15, %v1378_v56, 0.0  ;;  %v1347_v28 = vmul.f32 2.0, %v1315_v43  ;;  %v946_v32 = vmul.f32 %v914_v4, %v2526_v44  ;;  %vm600_vm6 = vcmp.eq.f32.partialorder %v2128_v0, inf }
 0x160   :  { %v1854_v24 = vpop.eup %1853  ;;  %1551 = vadd.xlane.f32.xlu1 %v1550_v1  ;;  %v1199_v34 = vand.u32 2147483648, %v2540_v42  ;;  %v809_v10 = vmul.f32 -0.0187293, %v2592_v11  ;;  %v1001_v35 = vsub.f32 1.0, %v2592_v11  ;;  %v601_v48 = vsel %vm600_vm6, %v2128_v0, %v2240_v60 }
 0x161   :  { %v1379_v51 = vmul.f32 %v1347_v28, %v1315_v43  ;;  %v1195_v40 = vmul.f32 %v1854_v24, %v2540_v42  ;;  %v947_v9 = vmul.f32 %v915_v2, %v2542_v58  ;;  %v603_v44 = vand.u32 2147483648, %v2128_v0 }
 0x162   :  { %v872_v29 = vmul.f32 %v840_v39, %v2561_v55  ;;  %v841_v41 = vadd.f32 0.074261, %v809_v10  ;;  %v2609_v62 = vmax.f32 %v1001_v35, 0.0  ;;  %vm602_vm7 = vcmp.eq.f32.partialorder %v2128_v0, 0.0  ;;  %v2925_v10 = vld [vmem:[#allocation4_spill] sm:$0xff] }
 0x163   :  { %v1553_v19 = vsel %vm1537_vm15, %v1379_v51, 0.0  ;;  %v978_v3 = vadd.f32 1.5707288, %v946_v32  ;;  %v1197_v60 = vsel %vm1196_vm4, %v2540_v42, %v1195_v40  ;;  %v604_v61 = vsel %vm602_vm7, %v603_v44, %v601_v48 }
 0x164   :  { %1554 = vadd.xlane.f32.xlu0 %v1553_v19  ;;  %v1200_v58 = vsel %vm1198_vm5, %v1199_v34, %v1197_v60  ;;  %vm1203_vm8 = vcmp.eq.f32.partialorder %v2566_v20, inf  ;;  %vm1205_vm9 = vcmp.eq.f32.partialorder %v2566_v20, 0.0  ;;  %1859 = vrsqrt.f32 %v2609_v62  ;;  %v2924_v34 = vld [vmem:[#allocation2_spill] sm:$0xff] }
 0x165   :  { %v1298_v7 = vmul.f32 %v1200_v58, %v978_v3  ;;  %v979_v0 = vadd.f32 1.5707288, %v947_v9  ;;  %v1206_v38 = vand.u32 2147483648, %v2566_v20  ;;  %vm607_vm10 = vcmp.eq.f32.partialorder %v2149_v26, inf }
 0x166   :  { %v904_v57 = vadd.f32 -0.2121144, %v872_v29  ;;  %v873_v54 = vmul.f32 %v841_v41, %v2592_v11  ;;  %v2624_v17 = vmul.f32 0.5, %v604_v61  ;;  %v608_v42 = vsel %vm607_vm10, %v2149_v26, %v2412_v18 }
 0x167   :  { %v1856_v13 = vpop.eup %1855  ;;  %v1330_v30 = vsub.f32 1.5707964, %v1298_v7  ;;  %vm609_vm11 = vcmp.eq.f32.partialorder %v2149_v26, 0.0  ;;  %v610_v46 = vand.u32 2147483648, %v2149_v26  ;;  %vm712_vm12 = vcmp.eq.f32.partialorder %v2135_v5, inf }
 0x168   :  { %v1202_v31 = vmul.f32 %v1856_v13, %v2566_v20  ;;  %v806_v8 = vmul.f32 -0.0187293, %v2624_v17  ;;  %v998_v63 = vsub.f32 1.0, %v2624_v17  ;;  %v715_v49 = vand.u32 2147483648, %v2135_v5 }
 0x169   :  { %v1362_v33 = vmul.f32 2.0, %v1330_v30  ;;  %v611_v47 = vsel %vm609_vm11, %v610_v46, %v608_v42  ;;  %v713_v18 = vsel %vm712_vm12, %v2135_v5, %v2923_v45  ;;  %vm714_vm13 = vcmp.eq.f32.partialorder %v2135_v5, 0.0 }
 0x16a   :  { %v1204_v26 = vsel %vm1203_vm8, %v2566_v20, %v1202_v31  ;;  %v936_v23 = vmul.f32 %v904_v57, %v2561_v55  ;;  %v838_v50 = vadd.f32 0.074261, %v806_v8  ;;  %v2642_v16 = vmax.f32 %v998_v63, 0.0 }
 0x16b   :  { %v1858_v36 = vpop.eup %1857  ;;  %v1394_v27 = vmul.f32 %v1362_v33, %v1330_v30  ;;  %v1207_v37 = vsel %vm1205_vm9, %v1206_v38, %v1204_v26  ;;  %v905_v25 = vadd.f32 -0.2121144, %v873_v54  ;;  %v2646_v15 = vmul.f32 0.5, %v611_v47 }
 0x16c   :  { %v1299_v4 = vmul.f32 %v1207_v37, %v979_v0  ;;  %v1125_v5 = vmul.f32 %v1858_v36, %v2590_v59  ;;  %1861 = vrsqrt.f32 %v2642_v16  ;;  %v716_v53 = vsel %vm714_vm13, %v715_v49, %v713_v18 }
 0x16d   :  { %v1598_v56 = vsel %vm1537_vm15, %v1394_v27, 0.0  ;;  %vm1126_vm14 = vcmp.eq.f32.partialorder %v2590_v59, inf  ;;  %vm1128_vm0 = vcmp.eq.f32.partialorder %v2590_v59, 0.0  ;;  %v1129_v55 = vand.u32 2147483648, %v2590_v59 }
 0x16e   :  { %1599 = vadd.xlane.f32.xlu1 %v1598_v56  ;;  %v1331_v20 = vsub.f32 1.5707964, %v1299_v4  ;;  %v968_v43 = vadd.f32 1.5707288, %v936_v23  ;;  %v1127_v2 = vsel %vm1126_vm14, %v2590_v59, %v1125_v5  ;;  %v870_v39 = vmul.f32 %v838_v50, %v2624_v17  ;;  %v2704_v5 = vpop.xlane.xlu0 %1614 }
 0x16f   :  { %v1130_v1 = vsel %vm1128_vm0, %v1129_v55, %v1127_v2  ;;  %v807_v28 = vmul.f32 -0.0187293, %v2646_v15  ;;  %v999_v32 = vsub.f32 1.0, %v2646_v15  ;;  %v2658_v24 = vmul.f32 0.5, %v716_v53 }
 0x170   :  { %v2662_v35 = vmul.f32 %v2925_v10, %v2924_v34  ;;  %v1363_v48 = vmul.f32 2.0, %v1331_v20  ;;  %v1288_v51 = vmul.f32 %v1130_v1, %v968_v43  ;;  %v937_v40 = vmul.f32 %v905_v25, %v2592_v11 }
 0x171   :  { %v1860_v9 = vpop.eup %1859  ;;  %vm1133_vm1 = vcmp.eq.f32.partialorder %v2609_v62, inf  ;;  %v2666_v59 = vmax.f32 %v999_v32, 0.0  ;;  %v822_v44 = vmul.f32 -0.0187293, %v2658_v24  ;;  %v1014_v29 = vsub.f32 1.0, %v2658_v24 }
 0x172   :  { %v1395_v41 = vmul.f32 %v1363_v48, %v1331_v20  ;;  %v1320_v19 = vsub.f32 1.5707964, %v1288_v51  ;;  %v1132_v3 = vmul.f32 %v1860_v9, %v2609_v62  ;;  %vm1135_vm2 = vcmp.eq.f32.partialorder %v2609_v62, 0.0 }
 0x173   :  { %v1136_v60 = vand.u32 2147483648, %v2609_v62  ;;  %v902_v61 = vadd.f32 -0.2121144, %v870_v39  ;;  %v839_v58 = vadd.f32 0.074261, %v807_v28  ;;  %1863 = vrsqrt.f32 %v2666_v59 }
 0x174   :  { %v1601_v11 = vsel %vm1537_vm15, %v1395_v41, 0.0  ;;  %v1352_v7 = vmul.f32 2.0, %v1320_v19  ;;  %v969_v0 = vadd.f32 1.5707288, %v937_v40  ;;  %v1134_v38 = vsel %vm1133_vm1, %v2609_v62, %v1132_v3 }
 0x175   :  { %1602 = vadd.xlane.f32.xlu0 %v1601_v11  ;;  %v1137_v57 = vsel %vm1135_vm2, %v1136_v60, %v1134_v38  ;;  %v854_v54 = vadd.f32 0.074261, %v822_v44  ;;  %v2676_v42 = vmax.f32 %v1014_v29, 0.0  ;;  %vm649_vm3 = vcmp.eq.f32.partialorder %v2190_v6, inf  ;;  %v1618_v44 = vpop.xlane.xlu1 %1617  ;;  %v1621_v29 = vpop.xlane.xlu0 %1620 }
 0x176   :  { %v1384_v13 = vmul.f32 %v1352_v7, %v1320_v19  ;;  %v1289_v30 = vmul.f32 %v1137_v57, %v969_v0  ;;  %vm1112_vm4 = vcmp.eq.f32.partialorder %v2642_v16, inf  ;;  %v650_v46 = vsel %vm649_vm3, %v2190_v6, %v2588_v14 }
 0x177   :  { %v934_v31 = vmul.f32 %v902_v61, %v2624_v17  ;;  %v871_v8 = vmul.f32 %v839_v58, %v2646_v15  ;;  %1865 = vrsqrt.f32 %v2676_v42  ;;  %v652_v62 = vand.u32 2147483648, %v2190_v6 }
 0x178   :  { %v1568_v63 = vsel %vm1537_vm15, %v1384_v13, 0.0  ;;  %v1321_v49 = vsub.f32 1.5707964, %v1289_v30  ;;  %vm1114_vm5 = vcmp.eq.f32.partialorder %v2642_v16, 0.0  ;;  %vm651_vm6 = vcmp.eq.f32.partialorder %v2190_v6, 0.0 }
 0x179   :  { %v1862_v33 = vpop.eup %1861  ;;  %1569 = vadd.xlane.f32.xlu1 %v1568_v63  ;;  %v1115_v47 = vand.u32 2147483648, %v2642_v16  ;;  %v886_v14 = vmul.f32 %v854_v54, %v2658_v24  ;;  %v653_v17 = vsel %vm651_vm6, %v652_v62, %v650_v46  ;;  %vm642_vm7 = vcmp.eq.f32.partialorder %v2158_v21, inf  ;;  %v1624_v63 = vpop.xlane.xlu1 %1623 }
 0x17a   :  { %v1353_v45 = vmul.f32 2.0, %v1321_v49  ;;  %v1111_v18 = vmul.f32 %v1862_v33, %v2642_v16  ;;  %v2693_v26 = vmul.f32 0.5, %v653_v17  ;;  %v643_v23 = vsel %vm642_vm7, %v2158_v21, %v2416_v52 }
 0x17b   :  { %v966_v50 = vadd.f32 1.5707288, %v934_v31  ;;  %v903_v36 = vadd.f32 -0.2121144, %v871_v8  ;;  %vm644_vm8 = vcmp.eq.f32.partialorder %v2158_v21, 0.0  ;;  %v645_v6 = vand.u32 2147483648, %v2158_v21 }
 0x17c   :  { %v1385_v27 = vmul.f32 %v1353_v45, %v1321_v49  ;;  %v1113_v37 = vsel %vm1112_vm4, %v2642_v16, %v1111_v18  ;;  %v813_v25 = vmul.f32 -0.0187293, %v2693_v26  ;;  %v1005_v4 = vsub.f32 1.0, %v2693_v26  ;;  %v1627_v49 = vpop.xlane.xlu0 %1626 }
 0x17d   :  { %v1116_v52 = vsel %vm1114_vm5, %v1115_v47, %v1113_v37  ;;  %vm1119_vm9 = vcmp.eq.f32.partialorder %v2666_v59, inf  ;;  %v918_v53 = vadd.f32 -0.2121144, %v886_v14  ;;  %v646_v56 = vsel %vm644_vm8, %v645_v6, %v643_v23 }
 0x17e   :  { %v1571_v21 = vsel %vm1537_vm15, %v1385_v27, 0.0  ;;  %v1286_v55 = vmul.f32 %v1116_v52, %v966_v50  ;;  %v2710_v20 = vmax.f32 %v1005_v4, 0.0  ;;  %vm635_vm10 = vcmp.eq.f32.partialorder %v2924_v34, inf }
 0x17f   :  { %1572 = vadd.xlane.f32.xlu0 %v1571_v21  ;;  %v935_v43 = vmul.f32 %v903_v36, %v2646_v15  ;;  %v845_v2 = vadd.f32 0.074261, %v813_v25  ;;  %v2714_v39 = vmul.f32 0.5, %v646_v56  ;;  %v636_v16 = vsel %vm635_vm10, %v2924_v34, %v2662_v35 }
 0x180   :  { %v1864_v1 = vpop.eup %1863  ;;  %v1318_v28 = vsub.f32 1.5707964, %v1286_v55  ;;  %vm1121_vm11 = vcmp.eq.f32.partialorder %v2666_v59, 0.0  ;;  %1867 = vrsqrt.f32 %v2710_v20  ;;  %v638_v32 = vand.u32 2147483648, %v2924_v34 }
 0x181   :  { %v1118_v10 = vmul.f32 %v1864_v1, %v2666_v59  ;;  %v1122_v48 = vand.u32 2147483648, %v2666_v59  ;;  %v950_v15 = vmul.f32 %v918_v53, %v2658_v24  ;;  %vm637_vm12 = vcmp.eq.f32.partialorder %v2924_v34, 0.0 }
 0x182   :  { %v1350_v51 = vmul.f32 2.0, %v1318_v28  ;;  %v812_v40 = vmul.f32 -0.0187293, %v2714_v39  ;;  %v1004_v35 = vsub.f32 1.0, %v2714_v39  ;;  %v639_v9 = vsel %vm637_vm12, %v638_v32, %v636_v16 }
 0x183   :  { %v967_v41 = vadd.f32 1.5707288, %v935_v43  ;;  %v1120_v19 = vsel %vm1119_vm9, %v2666_v59, %v1118_v10  ;;  %vm1224_vm13 = vcmp.eq.f32.partialorder %v2676_v42, inf  ;;  %v877_v3 = vmul.f32 %v845_v2, %v2693_v26 }
 0x184   :  { %v1866_v24 = vpop.eup %1865  ;;  %v1382_v60 = vmul.f32 %v1350_v51, %v1318_v28  ;;  %v1123_v34 = vsel %vm1121_vm11, %v1122_v48, %v1120_v19  ;;  %v2734_v61 = vmax.f32 %v1004_v35, 0.0  ;;  %v2736_v58 = vmul.f32 0.5, %v639_v9 }
 0x185   :  { %v1287_v11 = vmul.f32 %v1123_v34, %v967_v41  ;;  %v1223_v7 = vmul.f32 %v1866_v24, %v2676_v42  ;;  %vm1226_vm14 = vcmp.eq.f32.partialorder %v2676_v42, 0.0  ;;  %v1227_v0 = vand.u32 2147483648, %v2676_v42 }
 0x186   :  { %v1562_v38 = vsel %vm1537_vm15, %v1382_v60, 0.0  ;;  %v982_v57 = vadd.f32 1.5707288, %v950_v15  ;;  %v844_v54 = vadd.f32 0.074261, %v812_v40  ;;  %1869 = vrsqrt.f32 %v2734_v61 }
 0x187   :  { %1563 = vadd.xlane.f32.xlu1 %v1562_v38  ;;  %v1319_v59 = vsub.f32 1.5707964, %v1287_v11  ;;  %v1225_v13 = vsel %vm1224_vm13, %v2676_v42, %v1223_v7  ;;  %v909_v30 = vadd.f32 -0.2121144, %v877_v3  ;;  %vm628_vm0 = vcmp.eq.f32.partialorder %v2171_v12, inf }
 0x188   :  { %v1228_v46 = vsel %vm1226_vm14, %v1227_v0, %v1225_v13  ;;  %v811_v31 = vmul.f32 -0.0187293, %v2736_v58  ;;  %v1003_v8 = vsub.f32 1.0, %v2736_v58  ;;  %v629_v62 = vsel %vm628_vm0, %v2171_v12, %v2584_v22 }
 0x189   :  { %v1351_v33 = vmul.f32 2.0, %v1319_v59  ;;  %v1302_v47 = vmul.f32 %v1228_v46, %v982_v57  ;;  %v631_v14 = vand.u32 2147483648, %v2171_v12  ;;  %v876_v17 = vmul.f32 %v844_v54, %v2714_v39 }
 0x18a   :  { %v2753_v42 = vmax.f32 %v1003_v8, 0.0  ;;  %vm630_vm1 = vcmp.eq.f32.partialorder %v2171_v12, 0.0  ;;  %vm1634_vm2 = vcmask 7168   ;;  %v941_v12 = vmul.f32 %v909_v30, %v2693_v26 }
 0x18b   :  { %v1383_v45 = vmul.f32 %v1351_v33, %v1319_v59  ;;  %v1334_v18 = vsub.f32 1.5707964, %v1302_v47  ;;  %v632_v23 = vsel %vm630_vm1, %v631_v14, %v629_v62  ;;  %1661 = vst.msk [vmem:[%s2915_s2 + $0xd0] sm:$0xff] %vm1634_vm2, %v1618_v44  ;;  %1660 = vst.msk [vmem:[%s2915_s2 + $0xc8] sm:$0xff] %vm1634_vm2, %v2704_v5  ;;  %v843_v22 = vadd.f32 0.074261, %v811_v31 }
 0x18c   :  { %1663 = vst.msk [vmem:[%s2915_s2 + $0xe0] sm:$0xff] %vm1634_vm2, %v1624_v63  ;;  %1662 = vst.msk [vmem:[%s2915_s2 + $0xd8] sm:$0xff] %vm1634_vm2, %v1621_v29  ;;  %1871 = vrsqrt.f32 %v2753_v42  ;;  %v778_v27 = vmul.f32 0.5, %v632_v23  ;;  %vm1161_vm3 = vcmp.eq.f32.partialorder %v2710_v20, inf  ;;  %v908_v25 = vadd.f32 -0.2121144, %v876_v17 }
 0x18d   :  { %1664 = vst.msk [vmem:[%s2915_s2 + $0xe8] sm:$0xff] %vm1634_vm2, %v1627_v49  ;;  %v1868_v50 = vpop.eup %1867  ;;  %v1565_v36 = vsel %vm1537_vm15, %v1383_v45, 0.0  ;;  %v1366_v6 = vmul.f32 2.0, %v1334_v18  ;;  %v1164_v5 = vand.u32 2147483648, %v2710_v20  ;;  %v973_v26 = vadd.f32 1.5707288, %v941_v12 }
 0x18e   :  { %1566 = vadd.xlane.f32.xlu0 %v1565_v36  ;;  %v1160_v37 = vmul.f32 %v1868_v50, %v2710_v20  ;;  %v810_v52 = vmul.f32 -0.0187293, %v778_v27  ;;  %v1002_v53 = vsub.f32 1.0, %v778_v27  ;;  %vm1163_vm4 = vcmp.eq.f32.partialorder %v2710_v20, 0.0 }
 0x18f   :  { %v1398_v4 = vmul.f32 %v1366_v6, %v1334_v18  ;;  %v875_v21 = vmul.f32 %v843_v22, %v2736_v58  ;;  %v940_v1 = vmul.f32 %v908_v25, %v2714_v39  ;;  %vm1154_vm5 = vcmp.eq.f32.partialorder %v2734_v61, inf }
 0x190   :  { %v1162_v56 = vsel %vm1161_vm3, %v2710_v20, %v1160_v37  ;;  %v1034_v2 = vmax.f32 %v1002_v53, 0.0  ;;  %v842_v32 = vadd.f32 0.074261, %v810_v52  ;;  %v1157_v20 = vand.u32 2147483648, %v2734_v61 }
 0x191   :  { %v1610_v55 = vsel %vm1537_vm15, %v1398_v4, 0.0  ;;  %v1165_v43 = vsel %vm1163_vm4, %v1164_v5, %v1162_v56  ;;  %v907_v15 = vadd.f32 -0.2121144, %v875_v21  ;;  %v972_v40 = vadd.f32 1.5707288, %v940_v1 }
 0x192   :  { %1611 = vadd.xlane.f32.xlu1 %v1610_v55  ;;  %v1293_v16 = vmul.f32 %v1165_v43, %v973_v26  ;;  %1873 = vrsqrt.f32 %v1034_v2  ;;  %vm1156_vm6 = vcmp.eq.f32.partialorder %v2734_v61, 0.0  ;;  %v874_v44 = vmul.f32 %v842_v32, %v778_v27 }
 0x193   :  { %v1870_v28 = vpop.eup %1869  ;;  %v939_v41 = vmul.f32 %v907_v15, %v2736_v58  ;;  %vm1147_vm7 = vcmp.eq.f32.partialorder %v2753_v42, inf  ;;  %v1150_v34 = vand.u32 2147483648, %v2753_v42  ;;  %vm1149_vm8 = vcmp.eq.f32.partialorder %v2753_v42, 0.0 }
 0x194   :  { %v1325_v10 = vsub.f32 1.5707964, %v1293_v16  ;;  %v1153_v48 = vmul.f32 %v1870_v28, %v2734_v61  ;;  %v906_v11 = vadd.f32 -0.2121144, %v874_v44  ;;  %vm1140_vm9 = vcmp.eq.f32.partialorder %v1034_v2, inf }
 0x195   :  { %v1143_v62 = vand.u32 2147483648, %v1034_v2  ;;  %vm1142_vm10 = vcmp.eq.f32.partialorder %v1034_v2, 0.0  ;;  %v2926_v22 = vmov 0.0  }
 0x196   :  { %v1357_v51 = vmul.f32 2.0, %v1325_v10  ;;  %v1155_v35 = vsel %vm1154_vm5, %v2734_v61, %v1153_v48  ;;  %v971_v61 = vadd.f32 1.5707288, %v939_v41  ;;  %v938_v54 = vmul.f32 %v906_v11, %v778_v27 }
 0x197   :  { %v1158_v9 = vsel %vm1156_vm6, %v1157_v20, %v1155_v35 }
 0x198   :  { %v1389_v39 = vmul.f32 %v1357_v51, %v1325_v10  ;;  %v1292_v29 = vmul.f32 %v1158_v9, %v972_v40  ;;  %v970_v63 = vadd.f32 1.5707288, %v938_v54 }
 0x199   :  { %v1872_v19 = vpop.eup %1871 }
 0x19a   :  { %v1583_v3 = vsel %vm1537_vm15, %v1389_v39, 0.0  ;;  %v1324_v24 = vsub.f32 1.5707964, %v1292_v29  ;;  %v1146_v60 = vmul.f32 %v1872_v19, %v2753_v42 }
 0x19b   :  { %1584 = vadd.xlane.f32.xlu0 %v1583_v3 }
 0x19c   :  { %v1356_v7 = vmul.f32 2.0, %v1324_v24  ;;  %v1148_v0 = vsel %vm1147_vm7, %v2753_v42, %v1146_v60 }
 0x19d   :  { %v1151_v38 = vsel %vm1149_vm8, %v1150_v34, %v1148_v0 }
 0x19e   :  { %v1388_v58 = vmul.f32 %v1356_v7, %v1324_v24  ;;  %v1291_v57 = vmul.f32 %v1151_v38, %v971_v61 }
 0x19f   :  { %v1874_v59 = vpop.eup %1873  ;;  %v1546_v46 = vpop.xlane.xlu1 %1545 }
 0x1a0   :  { %v1580_v13 = vsel %vm1537_vm15, %v1388_v58, 0.0  ;;  %v1323_v30 = vsub.f32 1.5707964, %v1291_v57  ;;  %v1139_v31 = vmul.f32 %v1874_v59, %v1034_v2  ;;  %1637 = vst.msk [vmem:[%s2915_s2 + $0x10] sm:$0xff] %vm1634_vm2, %v1546_v46 }
 0x1a1   :  { %1581 = vadd.xlane.f32.xlu1 %v1580_v13 }
 0x1a2   :  { %v1355_v8 = vmul.f32 2.0, %v1323_v30  ;;  %v1141_v49 = vsel %vm1140_vm9, %v1034_v2, %v1139_v31 }
 0x1a3   :  { %v1144_v47 = vsel %vm1142_vm10, %v1143_v62, %v1141_v49  ;;  %v1549_v14 = vpop.xlane.xlu0 %1548 }
 0x1a4   :  { %v1387_v33 = vmul.f32 %v1355_v8, %v1323_v30  ;;  %v1290_v17 = vmul.f32 %v1144_v47, %v970_v63  ;;  %1638 = vst.msk [vmem:[%s2915_s2 + $0x18] sm:$0xff] %vm1634_vm2, %v1549_v14 }
 0x1a6   :  { %v1577_v42 = vsel %vm1537_vm15, %v1387_v33, 0.0  ;;  %v1322_v45 = vsub.f32 1.5707964, %v1290_v17 }
 0x1a7   :  { %1578 = vadd.xlane.f32.xlu0 %v1577_v42 }
 0x1a8   :  { %v1354_v18 = vmul.f32 2.0, %v1322_v45 }
 0x1aa   :  { %v1594_v23 = vpop.xlane.xlu1 %1593  ;;  %v1386_v12 = vmul.f32 %v1354_v18, %v1322_v45  ;;  %v1597_v50 = vpop.xlane.xlu0 %1596 }
 0x1ab   :  { %1632 = vadd.xlane.f32.xlu0 %v2926_v22  ;;  %1653 = vst.msk [vmem:[%s2915_s2 + $0x90] sm:$0xff] %vm1634_vm2, %v1594_v23  ;;  %1654 = vst.msk [vmem:[%s2915_s2 + $0x98] sm:$0xff] %vm1634_vm2, %v1597_v50 }
 0x1ac   :  { %v1574_v36 = vsel %vm1537_vm15, %v1386_v12, 0.0 }
 0x1ad   :  { %1575 = vadd.xlane.f32.xlu1 %v1574_v36 }
 0x1b1   :  { %1629 = vadd.xlane.f32.xlu1 %v2926_v22 }
 0x1b3   :  { %v1540_v6 = vpop.xlane.xlu1 %1539 }
 0x1b4   :  { %1635 = vst.msk [vmem:[%s2915_s2] sm:$0xff] %vm1634_vm2, %v1540_v6 }
 0x1b9   :  { %v1543_v27 = vpop.xlane.xlu0 %1542 }
 0x1ba   :  { %1636 = vst.msk [vmem:[%s2915_s2 + $0x8] sm:$0xff] %vm1634_vm2, %v1543_v27 }
 0x1c1   :  { %v1588_v37 = vpop.xlane.xlu1 %1587 }
 0x1c2   :  { %1651 = vst.msk [vmem:[%s2915_s2 + $0x80] sm:$0xff] %vm1634_vm2, %v1588_v37 }
 0x1ca   :  { %v1591_v25 = vpop.xlane.xlu0 %1590 }
 0x1cb   :  { %1652 = vst.msk [vmem:[%s2915_s2 + $0x88] sm:$0xff] %vm1634_vm2, %v1591_v25 }
 0x1d0   :  { %v1558_v4 = vpop.xlane.xlu1 %1557 }
 0x1d1   :  { %1641 = vst.msk [vmem:[%s2915_s2 + $0x30] sm:$0xff] %vm1634_vm2, %v1558_v4 }
 0x1d6   :  { %v1561_v5 = vpop.xlane.xlu0 %1560 }
 0x1d7   :  { %1642 = vst.msk [vmem:[%s2915_s2 + $0x38] sm:$0xff] %vm1634_vm2, %v1561_v5 }
 0x1dc   :  { %v1606_v52 = vpop.xlane.xlu1 %1605 }
 0x1dd   :  { %1657 = vst.msk [vmem:[%s2915_s2 + $0xb0] sm:$0xff] %vm1634_vm2, %v1606_v52 }
 0x1e1   :  { %v1609_v53 = vpop.xlane.xlu0 %1608 }
 0x1e2   :  { %1658 = vst.msk [vmem:[%s2915_s2 + $0xb8] sm:$0xff] %vm1634_vm2, %v1609_v53 }
 0x1e9   :  { %v1552_v26 = vpop.xlane.xlu1 %1551 }
 0x1ea   :  { %1639 = vst.msk [vmem:[%s2915_s2 + $0x20] sm:$0xff] %vm1634_vm2, %v1552_v26 }
 0x1ed   :  { %v1555_v56 = vpop.xlane.xlu0 %1554 }
 0x1ee   :  { %1640 = vst.msk [vmem:[%s2915_s2 + $0x28] sm:$0xff] %vm1634_vm2, %v1555_v56 }
 0x1f7   :  { %v1600_v21 = vpop.xlane.xlu1 %1599 }
 0x1f8   :  { %1655 = vst.msk [vmem:[%s2915_s2 + $0xa0] sm:$0xff] %vm1634_vm2, %v1600_v21 }
 0x1fe   :  { %v1603_v55 = vpop.xlane.xlu0 %1602 }
 0x1ff   :  { %1656 = vst.msk [vmem:[%s2915_s2 + $0xa8] sm:$0xff] %vm1634_vm2, %v1603_v55 }
 0x202   :  { %v1570_v43 = vpop.xlane.xlu1 %1569 }
 0x203   :  { %1645 = vst.msk [vmem:[%s2915_s2 + $0x50] sm:$0xff] %vm1634_vm2, %v1570_v43 }
 0x208   :  { %v1573_v2 = vpop.xlane.xlu0 %1572 }
 0x209   :  { %1646 = vst.msk [vmem:[%s2915_s2 + $0x58] sm:$0xff] %vm1634_vm2, %v1573_v2 }
 0x210   :  { %v1564_v16 = vpop.xlane.xlu1 %1563 }
 0x211   :  { %1643 = vst.msk [vmem:[%s2915_s2 + $0x40] sm:$0xff] %vm1634_vm2, %v1564_v16 }
 0x217   :  { %v1567_v1 = vpop.xlane.xlu0 %1566 }
 0x218   :  { %1644 = vst.msk [vmem:[%s2915_s2 + $0x48] sm:$0xff] %vm1634_vm2, %v1567_v1 }
 0x21b   :  { %v1612_v28 = vpop.xlane.xlu1 %1611 }
 0x21c   :  { %1659 = vst.msk [vmem:[%s2915_s2 + $0xc0] sm:$0xff] %vm1634_vm2, %v1612_v28 }
 0x224   :  { %v1585_v32 = vpop.xlane.xlu0 %1584 }
 0x225   :  { %1650 = vst.msk [vmem:[%s2915_s2 + $0x78] sm:$0xff] %vm1634_vm2, %v1585_v32 }
 0x22a   :  { %v1582_v10 = vpop.xlane.xlu1 %1581 }
 0x22b   :  { %1649 = vst.msk [vmem:[%s2915_s2 + $0x70] sm:$0xff] %vm1634_vm2, %v1582_v10 }
 0x230   :  { %v1579_v48 = vpop.xlane.xlu0 %1578 }
 0x231   :  { %1648 = vst.msk [vmem:[%s2915_s2 + $0x68] sm:$0xff] %vm1634_vm2, %v1579_v48 }
 0x234   :  { %v1633_v15 = vpop.xlane.xlu0 %1632 }
 0x235   :  { %1666 = vst.msk [vmem:[%s2915_s2 + $0xf8] sm:$0xff] %vm1634_vm2, %v1633_v15 }
 0x236   :  { %v1576_v20 = vpop.xlane.xlu1 %1575 }
 0x237   :  { %1647 = vst.msk [vmem:[%s2915_s2 + $0x60] sm:$0xff] %vm1634_vm2, %v1576_v20 }
 0x23a   :  { %v1630_v51 = vpop.xlane.xlu1 %1629 }
 0x23b   :  { %1665 = vst.msk [vmem:[%s2915_s2 + $0xf0] sm:$0xff] %vm1634_vm2, %v1630_v51 }

</bundles_post_ra>
